<compile_context>
chip_gen: v7x
topology: tpu7x:2x2x1
jax: 0.10.0
libtpu: 0.0.40
codegen_flags: <defaults>
</compile_context>

<pallas_src>
import functools

import jax
import jax.numpy as jnp
from jax.experimental import pallas as pl
from jax.experimental.pallas import tpu as pltpu


def _round_up(x, m):
    return (x + m - 1) // m * m


# ----------------------------------------------------------------------------
# Pallas kernel: one batch-block (BB batches, BB*T flattened rows) per grid step.
# ----------------------------------------------------------------------------
def _audio_encoder_kernel(x_ref, pool_ref,
                          w1, s1, t1,
                          w2, s2, t2,
                          w3, s3, t3,
                          w4, s4, t4,
                          wl, bl,
                          o_ref, *, seq_len):
    BT = x_ref.shape[0]                 # BB * T flattened rows
    T = seq_len

    h = x_ref[...].astype(jnp.float32)  # (BT, Cin_pad)

    # Per-row position inside its batch segment; used to zero the +/-1 tap rows
    # that would otherwise leak across flattened batch seams (conv padding=1).
    row = jax.lax.broadcasted_iota(jnp.int32, (BT, 1), 0)
    t_in_seq = row % T
    keep_prev = t_in_seq != 0            # row has a valid t-1 neighbour
    keep_next = t_in_seq != (T - 1)      # row has a valid t+1 neighbour

    def conv_bn_relu(h, w_ref, scale_ref, shift_ref):
        # +/-1 taps via XLU rolls (jnp.roll semantics) in f32, seam-masked,
        # then cast to bf16 *before* the lane concat (half the assembly bytes).
        prev = jnp.where(keep_prev, pltpu.roll(h, shift=1, axis=0), 0.0)
        nxt = jnp.where(keep_next, pltpu.roll(h, shift=BT - 1, axis=0), 0.0)
        lhs = jnp.concatenate([prev.astype(jnp.bfloat16),
                               h.astype(jnp.bfloat16),
                               nxt.astype(jnp.bfloat16)], axis=1)
        # im2col: single (BT, 3*Cin) @ (3*Cin, Cout) MXU matmul, f32 accumulate.
        y = jnp.dot(lhs, w_ref[...], preferred_element_type=jnp.float32)
        y = y * scale_ref[...] + shift_ref[...]   # fused conv-bias + BN(eval)
        return jnp.maximum(y, 0.0)                # ReLU, f32

    h = conv_bn_relu(h, w1, s1, t1)      # (BT,  64)
    h = conv_bn_relu(h, w2, s2, t2)      # (BT, 128)
    h = conv_bn_relu(h, w3, s3, t3)      # (BT, 256)
    h = conv_bn_relu(h, w4, s4, t4)      # (BT, 512)

    # AdaptiveAvgPool1d(1): block-diagonal (BB, BT) pooling matrix (1/T entries)
    # expressed as an MXU matmul, then the final Linear (padded to 128 lanes).
    pooled = jnp.dot(pool_ref[...], h.astype(jnp.bfloat16),
                     preferred_element_type=jnp.float32)          # (BB, 512)
    emb = jnp.dot(pooled.astype(jnp.bfloat16), wl[...],
                  preferred_element_type=jnp.float32) + bl[...]   # (BB, Epad)
    o_ref[...] = emb.astype(o_ref.dtype)


# ----------------------------------------------------------------------------
# Wrapper: layout plumbing (transpose, pads, im2col weight reshape, bf16 cast).
# ----------------------------------------------------------------------------
def audio_encoder_forward(x_nct, params, *, target_rows=512):
    """x_nct: (B, 13, T) float32, PyTorch NCW layout. Returns (B, E) float32."""
    x = jnp.transpose(x_nct, (0, 2, 1))            # (B, T, 13) channels-last
    B, T, cin0 = x.shape
    E = params["lin_b"].shape[-1]

    cin_pad = _round_up(cin0, 8)                   # 13 -> 16
    epad = _round_up(max(E, 1), 128)               # lane-dense output store

    # Batch blocking: fold batch into the matmul M dimension (~target_rows rows
    # per grid step keeps VMEM comfortably inside the default scoped limit on
    # v5e/v6e/v7x while filling the MXU M dimension).
    bb = min(B, max(1, target_rows // max(T, 1)))
    nblocks = pl.cdiv(B, bb)
    if nblocks > 1 and bb % 8 != 0:                # keep output blocks 8-aligned
        bb, nblocks = B, 1
    b_pad = nblocks * bb

    # Input: pad batch + channels, flatten (B, T, C) -> (B*T, C), bf16.
    xp = jnp.zeros((b_pad, T, cin_pad), jnp.float32)
    xp = xp.at[:B, :, :cin0].set(x)
    x2 = xp.reshape(b_pad * T, cin_pad).astype(jnp.bfloat16)

    # Block-diagonal pooling matrix: pool[b, r] = 1/T if r // T == b else 0.
    rr = jnp.arange(bb)[:, None]
    cc = jnp.arange(bb * T)[None, :] // T
    pool = jnp.where(rr == cc, 1.0 / T, 0.0).astype(jnp.bfloat16)   # (bb, bb*T)

    # Weights: (3, Cin, Cout) -> (3*Cin, Cout) bf16 (im2col layout), layer-1
    # Cin zero-padded to cin_pad. scale/shift stay f32.
    kws, kss, kts = [], [], []
    for i in range(4):
        W = params[f"w{i + 1}"]                    # (3, Cin, Cout) f32
        _, c_in, c_out = W.shape
        if i == 0 and c_in != cin_pad:
            W = jnp.pad(W, ((0, 0), (0, cin_pad - c_in), (0, 0)))
        kws.append(W.reshape(-1, c_out).astype(jnp.bfloat16))
        kss.append(params[f"s{i + 1}"].astype(jnp.float32))
        kts.append(params[f"t{i + 1}"].astype(jnp.float32))

    lin_w = jnp.zeros((512, epad), jnp.bfloat16)
    lin_w = lin_w.at[:, :E].set(params["lin_w"].astype(jnp.bfloat16))
    lin_b = jnp.zeros((1, epad), jnp.float32).at[:, :E].set(params["lin_b"])

    const2 = lambda i: (0, 0)
    in_specs = [pl.BlockSpec((bb * T, cin_pad), lambda i: (i, 0)),
                pl.BlockSpec(pool.shape, const2)]
    operands = [x2, pool]
    for W, s, t in zip(kws, kss, kts):
        in_specs += [pl.BlockSpec(W.shape, const2),
                     pl.BlockSpec(s.shape, const2),
                     pl.BlockSpec(t.shape, const2)]
        operands += [W, s, t]
    in_specs += [pl.BlockSpec(lin_w.shape, const2),
                 pl.BlockSpec(lin_b.shape, const2)]
    operands += [lin_w, lin_b]

    # Advisory cost estimate so XLA can overlap surrounding ops.
    chans = [cin_pad, 64, 128, 256, 512]
    flops = sum(2 * b_pad * T * 3 * chans[i] * chans[i + 1] for i in range(4))
    flops += 2 * b_pad * T * 512 + 2 * b_pad * 512 * epad
    bytes_accessed = (x2.size * 2 + pool.size * 2
                      + sum(w.size * 2 for w in kws)
                      + sum(s.size * 4 + t.size * 4 for s, t in zip(kss, kts))
                      + lin_w.size * 2 + lin_b.size * 4 + b_pad * epad * 4)
    cost = pl.CostEstimate(flops=int(flops), transcendentals=0,
                           bytes_accessed=int(bytes_accessed))

    out = pl.pallas_call(
        functools.partial(_audio_encoder_kernel, seq_len=T),
        out_shape=jax.ShapeDtypeStruct((b_pad, epad), jnp.float32),
        grid_spec=pltpu.PrefetchScalarGridSpec(
            num_scalar_prefetch=0,
            grid=(nblocks,),
            in_specs=in_specs,
            out_specs=pl.BlockSpec((bb, epad), lambda i: (i, 0)),
        ),
        compiler_params=pltpu.CompilerParams(
            dimension_semantics=("parallel",)),
        cost_estimate=cost,
    )(*operands)
    return out[:B, :E]                             # strip batch / lane padding


# ----------------------------------------------------------------------------
# Deterministic parameter construction (mirrors nn.Module shapes, BN eval-mode
# folded with the conv bias into per-channel scale/shift).
# ----------------------------------------------------------------------------
def make_params(key, embedding_dim):
    chans = [13, 64, 128, 256, 512]
    eps = 1e-5
    params = {}
    for i in range(4):
        cin, cout = chans[i], chans[i + 1]
        key, k_w, k_b, k_g, k_be, k_m, k_v = jax.random.split(key, 7)
        # PyTorch Conv1d weight layout: (Cout, Cin, K) -> (K, Cin, Cout)
        w_pt = jax.random.normal(k_w, (cout, cin, 3), jnp.float32) * 0.05
        b_conv = jax.random.normal(k_b, (cout,), jnp.float32) * 0.05
        gamma = 1.0 + 0.1 * jax.random.normal(k_g, (cout,), jnp.float32)
        beta = 0.1 * jax.random.normal(k_be, (cout,), jnp.float32)
        r_mean = 0.1 * jax.random.normal(k_m, (cout,), jnp.float32)
        r_var = jax.random.uniform(k_v, (cout,), jnp.float32, 0.5, 1.5)
        scale = gamma / jnp.sqrt(r_var + eps)
        shift = beta + (b_conv - r_mean) * scale
        params[f"w{i + 1}"] = jnp.transpose(w_pt, (2, 1, 0))      # (3, Cin, Cout)
        params[f"s{i + 1}"] = scale.reshape(1, cout)
        params[f"t{i + 1}"] = shift.reshape(1, cout)
    key, k_lw, k_lb = jax.random.split(key, 3)
    lin_w_pt = jax.random.normal(k_lw, (embedding_dim, 512), jnp.float32) * 0.02
    lin_b = jax.random.normal(k_lb, (embedding_dim,), jnp.float32) * 0.02
    params["lin_w"] = jnp.transpose(lin_w_pt)                     # (512, E)
    params["lin_b"] = lin_b.reshape(1, embedding_dim)
    return params


# ----------------------------------------------------------------------------
# Plain-JAX f32 reference for a correctness spot-check.
# ----------------------------------------------------------------------------
def reference_forward(x_nct, params):
    h = jnp.transpose(x_nct, (0, 2, 1))            # (B, T, C)
    T = h.shape[1]
    for i in range(4):
        W = params[f"w{i + 1}"]
        hp = jnp.pad(h, ((0, 0), (1, 1), (0, 0)))
        y = (jnp.einsum("btc,cd->btd", hp[:, 0:T], W[0])
             + jnp.einsum("btc,cd->btd", hp[:, 1:T + 1], W[1])
             + jnp.einsum("btc,cd->btd", hp[:, 2:T + 2], W[2]))
        y = y * params[f"s{i + 1}"] + params[f"t{i + 1}"]
        h = jnp.maximum(y, 0.0)
    pooled = jnp.mean(h, axis=1)                   # (B, 512)
    return pooled @ params["lin_w"] + params["lin_b"]


if __name__ == "__main__":
    B, T, E = 2, 16, 32                            # batch, seq length, embedding_dim
    key = jax.random.PRNGKey(0)
    key, kx = jax.random.split(key)
    x = jax.random.normal(kx, (B, 13, T), jnp.float32)   # PyTorch NCW input

    params = make_params(key, E)

    out = jax.block_until_ready(audio_encoder_forward(x, params))
    ref = reference_forward(x, params)

    assert out.shape == (B, E)
    # bf16 MXU operands (f32 accumulation) vs. f32 reference -> loosened tolerance.
    assert jnp.allclose(out, ref, atol=1e-2, rtol=5e-2), (
        "mismatch vs reference: max abs diff "
        f"{float(jnp.max(jnp.abs(out - ref)))}")

    print("KERNEL_OK")
</pallas_src>

<mosaic_0001>
module attributes {stable_mosaic.version = 11 : i64} {
  func.func @_audio_encoder_kernel(%arg0: i32, %arg1: memref<32x16xbf16, #tpu.memory_space<vmem>>, %arg2: memref<2x32xbf16, #tpu.memory_space<vmem>>, %arg3: memref<48x64xbf16, #tpu.memory_space<vmem>>, %arg4: memref<1x64xf32, #tpu.memory_space<vmem>>, %arg5: memref<1x64xf32, #tpu.memory_space<vmem>>, %arg6: memref<192x128xbf16, #tpu.memory_space<vmem>>, %arg7: memref<1x128xf32, #tpu.memory_space<vmem>>, %arg8: memref<1x128xf32, #tpu.memory_space<vmem>>, %arg9: memref<384x256xbf16, #tpu.memory_space<vmem>>, %arg10: memref<1x256xf32, #tpu.memory_space<vmem>>, %arg11: memref<1x256xf32, #tpu.memory_space<vmem>>, %arg12: memref<768x512xbf16, #tpu.memory_space<vmem>>, %arg13: memref<1x512xf32, #tpu.memory_space<vmem>>, %arg14: memref<1x512xf32, #tpu.memory_space<vmem>>, %arg15: memref<512x128xbf16, #tpu.memory_space<vmem>>, %arg16: memref<1x128xf32, #tpu.memory_space<vmem>>, %arg17: memref<2x128xf32, #tpu.memory_space<vmem>>) attributes {dimension_semantics = [#tpu.dimension_semantics<parallel>], iteration_bounds = array<i64: 1>, scalar_prefetch = 0 : i64, scratch_operands = 0 : i64, tpu.core_type = #tpu.core_type<tc>, window_params = [{transform_indices = @transform_0, window_bounds = array<i64: 32, 16>}, {pipeline_mode = #tpu.pipeline_mode<synchronous>, transform_indices = @transform_1, window_bounds = array<i64: 2, 32>}, {pipeline_mode = #tpu.pipeline_mode<synchronous>, transform_indices = @transform_2, window_bounds = array<i64: 48, 64>}, {pipeline_mode = #tpu.pipeline_mode<synchronous>, transform_indices = @transform_3, window_bounds = array<i64: 1, 64>}, {pipeline_mode = #tpu.pipeline_mode<synchronous>, transform_indices = @transform_4, window_bounds = array<i64: 1, 64>}, {pipeline_mode = #tpu.pipeline_mode<synchronous>, transform_indices = @transform_5, window_bounds = array<i64: 192, 128>}, {pipeline_mode = #tpu.pipeline_mode<synchronous>, transform_indices = @transform_6, window_bounds = array<i64: 1, 128>}, {pipeline_mode = #tpu.pipeline_mode<synchronous>, transform_indices = @transform_7, window_bounds = array<i64: 1, 128>}, {pipeline_mode = #tpu.pipeline_mode<synchronous>, transform_indices = @transform_8, window_bounds = array<i64: 384, 256>}, {pipeline_mode = #tpu.pipeline_mode<synchronous>, transform_indices = @transform_9, window_bounds = array<i64: 1, 256>}, {pipeline_mode = #tpu.pipeline_mode<synchronous>, transform_indices = @transform_10, window_bounds = array<i64: 1, 256>}, {pipeline_mode = #tpu.pipeline_mode<synchronous>, transform_indices = @transform_11, window_bounds = array<i64: 768, 512>}, {pipeline_mode = #tpu.pipeline_mode<synchronous>, transform_indices = @transform_12, window_bounds = array<i64: 1, 512>}, {pipeline_mode = #tpu.pipeline_mode<synchronous>, transform_indices = @transform_13, window_bounds = array<i64: 1, 512>}, {pipeline_mode = #tpu.pipeline_mode<synchronous>, transform_indices = @transform_14, window_bounds = array<i64: 512, 128>}, {pipeline_mode = #tpu.pipeline_mode<synchronous>, transform_indices = @transform_15, window_bounds = array<i64: 1, 128>}, {transform_indices = @transform_16, window_bounds = array<i64: 2, 128>}]} {
    %c0 = arith.constant 0 : index
    %c0_0 = arith.constant 0 : index
    %0 = vector.load %arg1[%c0, %c0_0] : memref<32x16xbf16, #tpu.memory_space<vmem>>, vector<32x16xbf16>
    %1 = arith.extf %0 : vector<32x16xbf16> to vector<32x16xf32>
    %2 = tpu.iota {dimensions = array<i32: 0>} : vector<32x1xi32>
    %c16_i32 = arith.constant 16 : i32
    %c0_i32 = arith.constant 0 : i32
    %3 = arith.cmpi eq, %c16_i32, %c0_i32 : i32
    %c1_i32 = arith.constant 1 : i32
    %4 = arith.select %3, %c1_i32, %c16_i32 : i32
    %5 = vector.broadcast %4 : i32 to vector<32x1xi32>
    %6 = arith.remsi %2, %5 : vector<32x1xi32>
    %c0_i32_1 = arith.constant 0 : i32
    %7 = vector.broadcast %c0_i32_1 : i32 to vector<32x1xi32>
    %8 = arith.cmpi ne, %6, %7 : vector<32x1xi32>
    %c0_i32_2 = arith.constant 0 : i32
    %9 = vector.broadcast %c0_i32_2 : i32 to vector<32x1xi32>
    %10 = arith.cmpi slt, %6, %9 : vector<32x1xi32>
    %c0_i32_3 = arith.constant 0 : i32
    %11 = arith.cmpi slt, %4, %c0_i32_3 : i32
    %12 = vector.broadcast %11 : i1 to vector<32x1xi1>
    %13 = vector.broadcast %12 : vector<32x1xi1> to vector<32x1xi1>
    %14 = arith.xori %10, %13 : vector<32x1xi1>
    %15 = arith.andi %14, %8 : vector<32x1xi1>
    %16 = vector.broadcast %4 : i32 to vector<32x1xi32>
    %17 = arith.addi %6, %16 : vector<32x1xi32>
    %18 = arith.select %15, %17, %6 : vector<32x1xi1>, vector<32x1xi32>
    %c0_i32_4 = arith.constant 0 : i32
    %19 = vector.broadcast %c0_i32_4 : i32 to vector<32x1xi32>
    %20 = arith.cmpi ne, %18, %19 : vector<32x1xi32>
    %c15_i32 = arith.constant 15 : i32
    %21 = vector.broadcast %c15_i32 : i32 to vector<32x1xi32>
    %22 = arith.cmpi ne, %18, %21 : vector<32x1xi32>
    %c1_i32_5 = arith.constant 1 : i32
    %23 = tpu.dynamic_rotate %1 by %c1_i32_5 dim 0 : vector<32x16xf32>, i32 -> vector<32x16xf32>
    %cst = arith.constant 0.000000e+00 : f32
    %24 = vector.shape_cast %20 : vector<32x1xi1> to vector<32x1xi1>
    %25 = vector.broadcast %24 : vector<32x1xi1> to vector<32x16xi1>
    %26 = vector.broadcast %cst : f32 to vector<32x16xf32>
    %27 = arith.select %25, %23, %26 : vector<32x16xi1>, vector<32x16xf32>
    %c31_i32 = arith.constant 31 : i32
    %28 = tpu.dynamic_rotate %1 by %c31_i32 dim 0 : vector<32x16xf32>, i32 -> vector<32x16xf32>
    %cst_6 = arith.constant 0.000000e+00 : f32
    %29 = vector.shape_cast %22 : vector<32x1xi1> to vector<32x1xi1>
    %30 = vector.broadcast %29 : vector<32x1xi1> to vector<32x16xi1>
    %31 = vector.broadcast %cst_6 : f32 to vector<32x16xf32>
    %32 = arith.select %30, %28, %31 : vector<32x16xi1>, vector<32x16xf32>
    %33 = arith.truncf %27 : vector<32x16xf32> to vector<32x16xbf16>
    %34 = arith.truncf %1 : vector<32x16xf32> to vector<32x16xbf16>
    %35 = arith.truncf %32 : vector<32x16xf32> to vector<32x16xbf16>
    %36 = tpu.concatenate %33, %34, %35 in 1 : vector<32x16xbf16>, vector<32x16xbf16>, vector<32x16xbf16> -> vector<32x48xbf16>
    %c0_7 = arith.constant 0 : index
    %c0_8 = arith.constant 0 : index
    %37 = vector.load %arg3[%c0_7, %c0_8] : memref<48x64xbf16, #tpu.memory_space<vmem>>, vector<48x64xbf16>
    %cst_9 = arith.constant dense<0.000000e+00> : vector<32x64xf32>
    %38 = tpu.matmul %36, %37, %cst_9 {dimension_numbers = #tpu.dot_dimension_numbers<[1], [0], [0], [1], [0, 0, 1, 1], [], []>} : vector<32x48xbf16>, vector<48x64xbf16>, vector<32x64xf32> -> vector<32x64xf32>
    %c0_10 = arith.constant 0 : index
    %c0_11 = arith.constant 0 : index
    %39 = vector.load %arg4[%c0_10, %c0_11] : memref<1x64xf32, #tpu.memory_space<vmem>>, vector<1x64xf32>
    %40 = vector.broadcast %39 : vector<1x64xf32> to vector<32x64xf32>
    %41 = arith.mulf %38, %40 : vector<32x64xf32>
    %c0_12 = arith.constant 0 : index
    %c0_13 = arith.constant 0 : index
    %42 = vector.load %arg5[%c0_12, %c0_13] : memref<1x64xf32, #tpu.memory_space<vmem>>, vector<1x64xf32>
    %43 = vector.broadcast %42 : vector<1x64xf32> to vector<32x64xf32>
    %44 = arith.addf %41, %43 : vector<32x64xf32>
    %cst_14 = arith.constant 0.000000e+00 : f32
    %45 = vector.broadcast %cst_14 : f32 to vector<32x64xf32>
    %46 = arith.maximumf %44, %45 : vector<32x64xf32>
    %c1_i32_15 = arith.constant 1 : i32
    %47 = tpu.dynamic_rotate %46 by %c1_i32_15 dim 0 : vector<32x64xf32>, i32 -> vector<32x64xf32>
    %cst_16 = arith.constant 0.000000e+00 : f32
    %48 = vector.shape_cast %20 : vector<32x1xi1> to vector<32x1xi1>
    %49 = vector.broadcast %48 : vector<32x1xi1> to vector<32x64xi1>
    %50 = vector.broadcast %cst_16 : f32 to vector<32x64xf32>
    %51 = arith.select %49, %47, %50 : vector<32x64xi1>, vector<32x64xf32>
    %c31_i32_17 = arith.constant 31 : i32
    %52 = tpu.dynamic_rotate %46 by %c31_i32_17 dim 0 : vector<32x64xf32>, i32 -> vector<32x64xf32>
    %cst_18 = arith.constant 0.000000e+00 : f32
    %53 = vector.shape_cast %22 : vector<32x1xi1> to vector<32x1xi1>
    %54 = vector.broadcast %53 : vector<32x1xi1> to vector<32x64xi1>
    %55 = vector.broadcast %cst_18 : f32 to vector<32x64xf32>
    %56 = arith.select %54, %52, %55 : vector<32x64xi1>, vector<32x64xf32>
    %57 = arith.truncf %51 : vector<32x64xf32> to vector<32x64xbf16>
    %58 = arith.truncf %46 : vector<32x64xf32> to vector<32x64xbf16>
    %59 = arith.truncf %56 : vector<32x64xf32> to vector<32x64xbf16>
    %60 = tpu.concatenate %57, %58, %59 in 1 : vector<32x64xbf16>, vector<32x64xbf16>, vector<32x64xbf16> -> vector<32x192xbf16>
    %c0_19 = arith.constant 0 : index
    %c0_20 = arith.constant 0 : index
    %61 = vector.load %arg6[%c0_19, %c0_20] : memref<192x128xbf16, #tpu.memory_space<vmem>>, vector<192x128xbf16>
    %cst_21 = arith.constant dense<0.000000e+00> : vector<32x128xf32>
    %62 = tpu.matmul %60, %61, %cst_21 {dimension_numbers = #tpu.dot_dimension_numbers<[1], [0], [0], [1], [0, 0, 1, 1], [], []>} : vector<32x192xbf16>, vector<192x128xbf16>, vector<32x128xf32> -> vector<32x128xf32>
    %c0_22 = arith.constant 0 : index
    %c0_23 = arith.constant 0 : index
    %63 = vector.load %arg7[%c0_22, %c0_23] : memref<1x128xf32, #tpu.memory_space<vmem>>, vector<1x128xf32>
    %64 = vector.broadcast %63 : vector<1x128xf32> to vector<32x128xf32>
    %65 = arith.mulf %62, %64 : vector<32x128xf32>
    %c0_24 = arith.constant 0 : index
    %c0_25 = arith.constant 0 : index
    %66 = vector.load %arg8[%c0_24, %c0_25] : memref<1x128xf32, #tpu.memory_space<vmem>>, vector<1x128xf32>
    %67 = vector.broadcast %66 : vector<1x128xf32> to vector<32x128xf32>
    %68 = arith.addf %65, %67 : vector<32x128xf32>
    %cst_26 = arith.constant 0.000000e+00 : f32
    %69 = vector.broadcast %cst_26 : f32 to vector<32x128xf32>
    %70 = arith.maximumf %68, %69 : vector<32x128xf32>
    %c1_i32_27 = arith.constant 1 : i32
    %71 = tpu.dynamic_rotate %70 by %c1_i32_27 dim 0 : vector<32x128xf32>, i32 -> vector<32x128xf32>
    %cst_28 = arith.constant 0.000000e+00 : f32
    %72 = vector.shape_cast %20 : vector<32x1xi1> to vector<32x1xi1>
    %73 = vector.broadcast %72 : vector<32x1xi1> to vector<32x128xi1>
    %74 = vector.broadcast %cst_28 : f32 to vector<32x128xf32>
    %75 = arith.select %73, %71, %74 : vector<32x128xi1>, vector<32x128xf32>
    %c31_i32_29 = arith.constant 31 : i32
    %76 = tpu.dynamic_rotate %70 by %c31_i32_29 dim 0 : vector<32x128xf32>, i32 -> vector<32x128xf32>
    %cst_30 = arith.constant 0.000000e+00 : f32
    %77 = vector.shape_cast %22 : vector<32x1xi1> to vector<32x1xi1>
    %78 = vector.broadcast %77 : vector<32x1xi1> to vector<32x128xi1>
    %79 = vector.broadcast %cst_30 : f32 to vector<32x128xf32>
    %80 = arith.select %78, %76, %79 : vector<32x128xi1>, vector<32x128xf32>
    %81 = arith.truncf %75 : vector<32x128xf32> to vector<32x128xbf16>
    %82 = arith.truncf %70 : vector<32x128xf32> to vector<32x128xbf16>
    %83 = arith.truncf %80 : vector<32x128xf32> to vector<32x128xbf16>
    %84 = tpu.concatenate %81, %82, %83 in 1 : vector<32x128xbf16>, vector<32x128xbf16>, vector<32x128xbf16> -> vector<32x384xbf16>
    %c0_31 = arith.constant 0 : index
    %c0_32 = arith.constant 0 : index
    %85 = vector.load %arg9[%c0_31, %c0_32] : memref<384x256xbf16, #tpu.memory_space<vmem>>, vector<384x256xbf16>
    %cst_33 = arith.constant dense<0.000000e+00> : vector<32x256xf32>
    %86 = tpu.matmul %84, %85, %cst_33 {dimension_numbers = #tpu.dot_dimension_numbers<[1], [0], [0], [1], [0, 0, 1, 1], [], []>} : vector<32x384xbf16>, vector<384x256xbf16>, vector<32x256xf32> -> vector<32x256xf32>
    %c0_34 = arith.constant 0 : index
    %c0_35 = arith.constant 0 : index
    %87 = vector.load %arg10[%c0_34, %c0_35] : memref<1x256xf32, #tpu.memory_space<vmem>>, vector<1x256xf32>
    %88 = vector.broadcast %87 : vector<1x256xf32> to vector<32x256xf32>
    %89 = arith.mulf %86, %88 : vector<32x256xf32>
    %c0_36 = arith.constant 0 : index
    %c0_37 = arith.constant 0 : index
    %90 = vector.load %arg11[%c0_36, %c0_37] : memref<1x256xf32, #tpu.memory_space<vmem>>, vector<1x256xf32>
    %91 = vector.broadcast %90 : vector<1x256xf32> to vector<32x256xf32>
    %92 = arith.addf %89, %91 : vector<32x256xf32>
    %cst_38 = arith.constant 0.000000e+00 : f32
    %93 = vector.broadcast %cst_38 : f32 to vector<32x256xf32>
    %94 = arith.maximumf %92, %93 : vector<32x256xf32>
    %c1_i32_39 = arith.constant 1 : i32
    %95 = tpu.dynamic_rotate %94 by %c1_i32_39 dim 0 : vector<32x256xf32>, i32 -> vector<32x256xf32>
    %cst_40 = arith.constant 0.000000e+00 : f32
    %96 = vector.shape_cast %20 : vector<32x1xi1> to vector<32x1xi1>
    %97 = vector.broadcast %96 : vector<32x1xi1> to vector<32x256xi1>
    %98 = vector.broadcast %cst_40 : f32 to vector<32x256xf32>
    %99 = arith.select %97, %95, %98 : vector<32x256xi1>, vector<32x256xf32>
    %c31_i32_41 = arith.constant 31 : i32
    %100 = tpu.dynamic_rotate %94 by %c31_i32_41 dim 0 : vector<32x256xf32>, i32 -> vector<32x256xf32>
    %cst_42 = arith.constant 0.000000e+00 : f32
    %101 = vector.shape_cast %22 : vector<32x1xi1> to vector<32x1xi1>
    %102 = vector.broadcast %101 : vector<32x1xi1> to vector<32x256xi1>
    %103 = vector.broadcast %cst_42 : f32 to vector<32x256xf32>
    %104 = arith.select %102, %100, %103 : vector<32x256xi1>, vector<32x256xf32>
    %105 = arith.truncf %99 : vector<32x256xf32> to vector<32x256xbf16>
    %106 = arith.truncf %94 : vector<32x256xf32> to vector<32x256xbf16>
    %107 = arith.truncf %104 : vector<32x256xf32> to vector<32x256xbf16>
    %108 = tpu.concatenate %105, %106, %107 in 1 : vector<32x256xbf16>, vector<32x256xbf16>, vector<32x256xbf16> -> vector<32x768xbf16>
    %c0_43 = arith.constant 0 : index
    %c0_44 = arith.constant 0 : index
    %109 = vector.load %arg12[%c0_43, %c0_44] : memref<768x512xbf16, #tpu.memory_space<vmem>>, vector<768x512xbf16>
    %cst_45 = arith.constant dense<0.000000e+00> : vector<32x512xf32>
    %110 = tpu.matmul %108, %109, %cst_45 {dimension_numbers = #tpu.dot_dimension_numbers<[1], [0], [0], [1], [0, 0, 1, 1], [], []>} : vector<32x768xbf16>, vector<768x512xbf16>, vector<32x512xf32> -> vector<32x512xf32>
    %c0_46 = arith.constant 0 : index
    %c0_47 = arith.constant 0 : index
    %111 = vector.load %arg13[%c0_46, %c0_47] : memref<1x512xf32, #tpu.memory_space<vmem>>, vector<1x512xf32>
    %112 = vector.broadcast %111 : vector<1x512xf32> to vector<32x512xf32>
    %113 = arith.mulf %110, %112 : vector<32x512xf32>
    %c0_48 = arith.constant 0 : index
    %c0_49 = arith.constant 0 : index
    %114 = vector.load %arg14[%c0_48, %c0_49] : memref<1x512xf32, #tpu.memory_space<vmem>>, vector<1x512xf32>
    %115 = vector.broadcast %114 : vector<1x512xf32> to vector<32x512xf32>
    %116 = arith.addf %113, %115 : vector<32x512xf32>
    %cst_50 = arith.constant 0.000000e+00 : f32
    %117 = vector.broadcast %cst_50 : f32 to vector<32x512xf32>
    %118 = arith.maximumf %116, %117 : vector<32x512xf32>
    %c0_51 = arith.constant 0 : index
    %c0_52 = arith.constant 0 : index
    %119 = vector.load %arg2[%c0_51, %c0_52] : memref<2x32xbf16, #tpu.memory_space<vmem>>, vector<2x32xbf16>
    %120 = arith.truncf %118 : vector<32x512xf32> to vector<32x512xbf16>
    %cst_53 = arith.constant dense<0.000000e+00> : vector<2x512xf32>
    %121 = tpu.matmul %119, %120, %cst_53 {dimension_numbers = #tpu.dot_dimension_numbers<[1], [0], [0], [1], [0, 0, 1, 1], [], []>} : vector<2x32xbf16>, vector<32x512xbf16>, vector<2x512xf32> -> vector<2x512xf32>
    %122 = arith.truncf %121 : vector<2x512xf32> to vector<2x512xbf16>
    %c0_54 = arith.constant 0 : index
    %c0_55 = arith.constant 0 : index
    %123 = vector.load %arg15[%c0_54, %c0_55] : memref<512x128xbf16, #tpu.memory_space<vmem>>, vector<512x128xbf16>
    %cst_56 = arith.constant dense<0.000000e+00> : vector<2x128xf32>
    %124 = tpu.matmul %122, %123, %cst_56 {dimension_numbers = #tpu.dot_dimension_numbers<[1], [0], [0], [1], [0, 0, 1, 1], [], []>} : vector<2x512xbf16>, vector<512x128xbf16>, vector<2x128xf32> -> vector<2x128xf32>
    %c0_57 = arith.constant 0 : index
    %c0_58 = arith.constant 0 : index
    %125 = vector.load %arg16[%c0_57, %c0_58] : memref<1x128xf32, #tpu.memory_space<vmem>>, vector<1x128xf32>
    %126 = vector.broadcast %125 : vector<1x128xf32> to vector<2x128xf32>
    %127 = arith.addf %124, %126 : vector<2x128xf32>
    %c0_59 = arith.constant 0 : index
    %c0_60 = arith.constant 0 : index
    %128 = vector.load %arg17[%c0_59, %c0_60] : memref<2x128xf32, #tpu.memory_space<vmem>>, vector<2x128xf32>
    tpu.vector_store %arg17[%c0_59, %c0_60], %127 {strides = array<i32>} : memref<2x128xf32, #tpu.memory_space<vmem>>, vector<2x128xf32>,
    return
  }
  func.func @transform_0(%arg0: i32) -> (i32, i32) {
    %c0_i32 = arith.constant 0 : i32
    %c0_i32_0 = arith.constant 0 : i32
    return %arg0, %c0_i32 : i32, i32
  }
  func.func @transform_1(%arg0: i32) -> (i32, i32) {
    %c0_i32 = arith.constant 0 : i32
    %c0_i32_0 = arith.constant 0 : i32
    %c0_i32_1 = arith.constant 0 : i32
    return %c0_i32, %c0_i32_0 : i32, i32
  }
  func.func @transform_2(%arg0: i32) -> (i32, i32) {
    %c0_i32 = arith.constant 0 : i32
    %c0_i32_0 = arith.constant 0 : i32
    %c0_i32_1 = arith.constant 0 : i32
    return %c0_i32, %c0_i32_0 : i32, i32
  }
  func.func @transform_3(%arg0: i32) -> (i32, i32) {
    %c0_i32 = arith.constant 0 : i32
    %c0_i32_0 = arith.constant 0 : i32
    %c0_i32_1 = arith.constant 0 : i32
    return %c0_i32, %c0_i32_0 : i32, i32
  }
  func.func @transform_4(%arg0: i32) -> (i32, i32) {
    %c0_i32 = arith.constant 0 : i32
    %c0_i32_0 = arith.constant 0 : i32
    %c0_i32_1 = arith.constant 0 : i32
    return %c0_i32, %c0_i32_0 : i32, i32
  }
  func.func @transform_5(%arg0: i32) -> (i32, i32) {
    %c0_i32 = arith.constant 0 : i32
    %c0_i32_0 = arith.constant 0 : i32
    %c0_i32_1 = arith.constant 0 : i32
    return %c0_i32, %c0_i32_0 : i32, i32
  }
  func.func @transform_6(%arg0: i32) -> (i32, i32) {
    %c0_i32 = arith.constant 0 : i32
    %c0_i32_0 = arith.constant 0 : i32
    %c0_i32_1 = arith.constant 0 : i32
    return %c0_i32, %c0_i32_0 : i32, i32
  }
  func.func @transform_7(%arg0: i32) -> (i32, i32) {
    %c0_i32 = arith.constant 0 : i32
    %c0_i32_0 = arith.constant 0 : i32
    %c0_i32_1 = arith.constant 0 : i32
    return %c0_i32, %c0_i32_0 : i32, i32
  }
  func.func @transform_8(%arg0: i32) -> (i32, i32) {
    %c0_i32 = arith.constant 0 : i32
    %c0_i32_0 = arith.constant 0 : i32
    %c0_i32_1 = arith.constant 0 : i32
    return %c0_i32, %c0_i32_0 : i32, i32
  }
  func.func @transform_9(%arg0: i32) -> (i32, i32) {
    %c0_i32 = arith.constant 0 : i32
    %c0_i32_0 = arith.constant 0 : i32
    %c0_i32_1 = arith.constant 0 : i32
    return %c0_i32, %c0_i32_0 : i32, i32
  }
  func.func @transform_10(%arg0: i32) -> (i32, i32) {
    %c0_i32 = arith.constant 0 : i32
    %c0_i32_0 = arith.constant 0 : i32
    %c0_i32_1 = arith.constant 0 : i32
    return %c0_i32, %c0_i32_0 : i32, i32
  }
  func.func @transform_11(%arg0: i32) -> (i32, i32) {
    %c0_i32 = arith.constant 0 : i32
    %c0_i32_0 = arith.constant 0 : i32
    %c0_i32_1 = arith.constant 0 : i32
    return %c0_i32, %c0_i32_0 : i32, i32
  }
  func.func @transform_12(%arg0: i32) -> (i32, i32) {
    %c0_i32 = arith.constant 0 : i32
    %c0_i32_0 = arith.constant 0 : i32
    %c0_i32_1 = arith.constant 0 : i32
    return %c0_i32, %c0_i32_0 : i32, i32
  }
  func.func @transform_13(%arg0: i32) -> (i32, i32) {
    %c0_i32 = arith.constant 0 : i32
    %c0_i32_0 = arith.constant 0 : i32
    %c0_i32_1 = arith.constant 0 : i32
    return %c0_i32, %c0_i32_0 : i32, i32
  }
  func.func @transform_14(%arg0: i32) -> (i32, i32) {
    %c0_i32 = arith.constant 0 : i32
    %c0_i32_0 = arith.constant 0 : i32
    %c0_i32_1 = arith.constant 0 : i32
    return %c0_i32, %c0_i32_0 : i32, i32
  }
  func.func @transform_15(%arg0: i32) -> (i32, i32) {
    %c0_i32 = arith.constant 0 : i32
    %c0_i32_0 = arith.constant 0 : i32
    %c0_i32_1 = arith.constant 0 : i32
    return %c0_i32, %c0_i32_0 : i32, i32
  }
  func.func @transform_16(%arg0: i32) -> (i32, i32) {
    %c0_i32 = arith.constant 0 : i32
    %c0_i32_0 = arith.constant 0 : i32
    return %arg0, %c0_i32 : i32, i32
  }
}

</mosaic_0001>

<bundles_post_ra>
// kernel: tpu_custom_call.1
= control target key start
LH: loop header
LB: loop body
LE: loop exit
PB: predicated region body
PF: predicated region fallthrough
CT: control target
= control target key end

     0   :  { %s4677_s0 = inlined_call_operand.vmem [shape: bf16[32,16], index: 0, kind: input, shape index: {}]   ;;  %s4678_s1 = inlined_call_operand.vmem [shape: bf16[2,32], index: 1, kind: input, shape index: {}]   ;;  %s4679_s2 = inlined_call_operand.vmem [shape: bf16[48,64], index: 2, kind: input, shape index: {}]   ;;  %s4680_s3 = inlined_call_operand.hbm [shape: f32[1,64], index: 3, kind: input, shape index: {}]   ;;  %s4681_s4 = inlined_call_operand.vmem [shape: f32[1,64], index: 4, kind: input, shape index: {}]   ;;  %s4682_s5 = inlined_call_operand.hbm [shape: bf16[192,128], index: 5, kind: input, shape index: {}]   ;;  %s4683_s6 = inlined_call_operand.vmem [shape: f32[1,128], index: 6, kind: input, shape index: {}]   ;;  %s4684_s7 = inlined_call_operand.vmem [shape: f32[1,128], index: 7, kind: input, shape index: {}]   ;;  %s4685_s8 = inlined_call_operand.hbm [shape: bf16[384,256], index: 8, kind: input, shape index: {}]   ;;  %s4686_s9 = inlined_call_operand.vmem [shape: f32[1,256], index: 9, kind: input, shape index: {}]   ;;  %s4687_s10 = inlined_call_operand.vmem [shape: f32[1,256], index: 10, kind: input, shape index: {}]   ;;  %s4688_s11 = inlined_call_operand.hbm [shape: bf16[768,512], index: 11, kind: input, shape index: {}]   ;;  %s4689_s12 = inlined_call_operand.vmem [shape: f32[1,512], index: 12, kind: input, shape index: {}]   ;;  %s4690_s13 = inlined_call_operand.vmem [shape: f32[1,512], index: 13, kind: input, shape index: {}]   ;;  %s4691_s14 = inlined_call_operand.hbm [shape: bf16[512,128], index: 14, kind: input, shape index: {}]   ;;  %s4692_s15 = inlined_call_operand.vmem [shape: f32[1,128], index: 15, kind: input, shape index: {}]   ;;  %s4693_s16 = inlined_call_operand.hbm [shape: f32[2,128], index: 16, kind: output, shape index: {}]  }
   0x1   :  { %4698 = sst [smem:[#allocation16_spill]] %s4677_s0 }
   0x2   :  { %21 = vsyncpa [#allocation3], 0 }
   0x3   :  { %22 = vsyncpa [#allocation6], 0 }
   0x4   :  { %23 = vsyncpa [#allocation9], 0 }
   0x5   :  { %24 = vsyncpa [#allocation4], 0  ;;  %s4172_s21 = smov [#allocation5]   ;;  %s4032_s25 = scalar_lea.hbm %s4682_s5, 1536 }
   0x6   :  { %s48_s22 = sshll.u32 %s4172_s21, 4  ;;  %p4033_p0 = scmp.ne.s32.totalorder %s4682_s5, %s4032_s25  ;;  %s49_s22 = int_to_ptr.vmem [resolvable:$true] %s48_s22 }
   0x7   :  { %p4036_p1 = scmp.lt.u32.totalorder %s4032_s25, %s4682_s5 }
   0x9   :  { %p4038_p2 = pnand %p4036_p1, %p4033_p0 }
   0xb   :  { %4041 = shalt.err (!%p4038_p2)
}
   0xc   :  { %s4042_s30 = scalar_lea.vmem %s49_s22, 1536  ;;  %p4047_p4 = scmp.lt.s32.totalorder %s49_s22, %s49_s22 }
   0xd   :  { %p4043_p3 = scmp.ne.s32.totalorder %s49_s22, %s4042_s30  ;;  %p4048_p5 = scmp.lt.s32.totalorder %s4042_s30, %s4042_s30 }
   0xf   :  { %p4049_p6 = por %p4048_p5, %p4047_p4 }
  0x11   :  { %p4050_p7 = pnand %p4049_p6, %p4043_p3 }
  0x13   :  { %4053 = shalt.err (!%p4050_p7)
}
  0x14   :  { %s4695_s0 = smov 64   ;;  %s4697_s17 = smov 4  }
  0x15   :  { %54 = dma.hbm_to_vmem [thread:$0]  %s4682_s5, 1536, %s49_s22, [#allocation6], %s4695_s0, %s4695_s0, %s4697_s17  }
  0x16   :  { %s4175_s20 = smov [#allocation8]   ;;  %s4054_s25 = scalar_lea.hbm %s4688_s11, 24576 }
  0x17   :  { %s80_s21 = sshll.u32 %s4175_s20, 4  ;;  %p4055_p8 = scmp.ne.s32.totalorder %s4688_s11, %s4054_s25  ;;  %s81_s21 = int_to_ptr.vmem [resolvable:$true] %s80_s21 }
  0x18   :  { %p4058_p9 = scmp.lt.u32.totalorder %s4054_s25, %s4688_s11 }
  0x1a   :  { %p4060_p10 = pnand %p4058_p9, %p4055_p8 }
  0x1c   :  { %4063 = shalt.err (!%p4060_p10)
}
  0x1d   :  { %s4064_s30 = scalar_lea.vmem %s81_s21, 24576  ;;  %p4069_p12 = scmp.lt.s32.totalorder %s81_s21, %s81_s21 }
  0x1e   :  { %p4065_p11 = scmp.ne.s32.totalorder %s81_s21, %s4064_s30  ;;  %p4070_p13 = scmp.lt.s32.totalorder %s4064_s30, %s4064_s30 }
  0x20   :  { %p4071_p0 = por %p4070_p13, %p4069_p12 }
  0x22   :  { %p4072_p1 = pnand %p4071_p0, %p4065_p11 }
  0x24   :  { %4075 = shalt.err (!%p4072_p1)
}
  0x25   :  { %s4176_s5 = smov 256   ;;  %s4177_s22 = smov 16  }
  0x26   :  { %86 = dma.hbm_to_vmem [thread:$0]  %s4688_s11, 24576, %s81_s21, [#allocation9], %s4176_s5, %s4176_s5, %s4177_s22  }
  0x27   :  { %s4178_s20 = smov [#allocation2]   ;;  %s4179_s24 = smov [#allocation7]  }
  0x28   :  { %s37_s23 = sshll.u32 %s4178_s20, 4  ;;  %s64_s25 = sshll.u32 %s4179_s24, 4  ;;  %s38_s23 = int_to_ptr.vmem [resolvable:$true] %s37_s23  ;;  %s4300_s25 = int_to_ptr.vmem [resolvable:$true] %s64_s25 }
  0x29   :  { %s4076_s28 = scalar_lea.hbm %s4680_s3, 16 }
  0x2a   :  { %p4077_p2 = scmp.ne.s32.totalorder %s4680_s3, %s4076_s28  ;;  %p4080_p3 = scmp.lt.u32.totalorder %s4076_s28, %s4680_s3 }
  0x2c   :  { %p4082_p4 = pnand %p4080_p3, %p4077_p2 }
  0x2e   :  { %4085 = shalt.err (!%p4082_p4)
}
  0x2f   :  { %s4086_s11 = scalar_lea.vmem %s38_s23, 16  ;;  %s4090_s21 = scalar_lea.vmem %s38_s23, 32 }
  0x30   :  { %p4087_p5 = scmp.ne.s32.totalorder %s38_s23, %s4086_s11  ;;  %p4091_p6 = scmp.lt.s32.totalorder %s38_s23, %s38_s23 }
  0x31   :  { %p4092_p7 = scmp.lt.s32.totalorder %s4090_s21, %s4086_s11 }
  0x33   :  { %p4093_p8 = por %p4092_p7, %p4091_p6 }
  0x35   :  { %p4094_p9 = pnand %p4093_p8, %p4087_p5 }
  0x37   :  { %4097 = shalt.err (!%p4094_p9)
}
  0x38   :  { %40 = dma.hbm_to_vmem [thread:$0]  %s4680_s3, 16, %s38_s23, [#allocation3]  }
  0x39   :  { %s4098_s24 = scalar_lea.hbm %s4685_s8, 6144 }
  0x3a   :  { %p4099_p10 = scmp.ne.s32.totalorder %s4685_s8, %s4098_s24  ;;  %p4102_p11 = scmp.lt.u32.totalorder %s4098_s24, %s4685_s8 }
  0x3c   :  { %p4104_p12 = pnand %p4102_p11, %p4099_p10 }
  0x3e   :  { %4107 = shalt.err (!%p4104_p12)
}
  0x3f   :  { %s4108_s28 = scalar_lea.vmem %s4300_s25, 6144  ;;  %p4113_p0 = scmp.lt.s32.totalorder %s4300_s25, %s4300_s25 }
  0x40   :  { %p4109_p13 = scmp.ne.s32.totalorder %s4300_s25, %s4108_s28  ;;  %p4114_p1 = scmp.lt.s32.totalorder %s4108_s28, %s4108_s28 }
  0x42   :  { %p4115_p2 = por %p4114_p1, %p4113_p0 }
  0x44   :  { %p4116_p3 = pnand %p4115_p2, %p4109_p13 }
  0x46   :  { %4119 = shalt.err (!%p4116_p3)
}
  0x47   :  { %s4180_s3 = smov 128   ;;  %s4181_s23 = smov 8  }
  0x48   :  { %70 = dma.hbm_to_vmem [thread:$0]  %s4685_s8, 6144, %s4300_s25, [#allocation6], %s4180_s3, %s4180_s3, %s4181_s23  }
  0x49   :  { %s4182_s11 = smov [#allocation10]   ;;  %s4120_s19 = scalar_lea.hbm %s4691_s14, 4096 }
  0x4a   :  { %s96_s21 = sshll.u32 %s4182_s11, 4  ;;  %p4121_p4 = scmp.ne.s32.totalorder %s4691_s14, %s4120_s19  ;;  %s97_s21 = int_to_ptr.vmem [resolvable:$true] %s96_s21 }
  0x4b   :  { %p4124_p5 = scmp.lt.u32.totalorder %s4120_s19, %s4691_s14 }
  0x4d   :  { %p4126_p6 = pnand %p4124_p5, %p4121_p4 }
  0x4f   :  { %4129 = shalt.err (!%p4126_p6)
}
  0x50   :  { %s4130_s26 = scalar_lea.vmem %s97_s21, 4096  ;;  %p4135_p8 = scmp.lt.s32.totalorder %s97_s21, %s97_s21 }
  0x51   :  { %p4131_p7 = scmp.ne.s32.totalorder %s97_s21, %s4130_s26  ;;  %p4136_p9 = scmp.lt.s32.totalorder %s4130_s26, %s4130_s26 }
  0x53   :  { %p4137_p10 = por %p4136_p9, %p4135_p8 }
  0x55   :  { %p4138_p11 = pnand %p4137_p10, %p4131_p7 }
  0x57   :  { %4141 = shalt.err (!%p4138_p11)
}
  0x58   :  { %s4699_s8 = smov 4   ;;  %s4700_s25 = smov 64  }
  0x59   :  { %102 = dma.hbm_to_vmem [thread:$0]  %s4691_s14, 4096, %s97_s21, [#allocation9], %s4700_s25, %s4700_s25, %s4699_s8  }
  0x5a   :  { %4164 = dma.done.wait [#allocation3], 16  }
  0x5b   :  { %4165 = vsyncadd [#allocation3], 4294967280 }
  0x5c   :  { %4166 = dma.done.wait [#allocation6], 7680  }
  0x5d   :  { %4167 = vsyncadd [#allocation6], 4294959616 }
  0x5e   :  { %4168 = dma.done.wait [#allocation9], 28672  }
  0x5f   :  { %4169 = vsyncadd [#allocation9], 4294938624  ;;  %v129_v0 = vlaneseq  ;;  %s4701_s23 = sld [smem:[#allocation16_spill]]  ;;  %v3623_v15 = vld [vmem:[%s4679_s2] sm:$0xff]   ;;  %v3624_v19 = vld [vmem:[%s4679_s2 + $0x8] sm:$0xff]   ;;  %vm256_vm6 = vcmask 130048  }
  0x60   :  { %3556 = vmatprep.subr.bf16.mxu0 %v3623_v15  ;;  %v3625_v24 = vld [vmem:[%s4679_s2 + $0x10] sm:$0xff]   ;;  %s4183_s2 = smov 32   ;;  %vm263_vm7 = vcmask 261120   ;;  %vm292_vm8 = vcmask 392192   ;;  %v3626_v54 = vld [vmem:[#allocation5] sm:$0xff]   ;;  %v4184_v55 = vmov 0  }
  0x61   :  { %v4346_v1 = vshrl.u32 %v129_v0, 7  ;;  %3557 = vmatpush3.bf16.msra.mxu0 %v3623_v15  ;;  %519 = vmatprep.subr.bf16.mxu1 %v4184_v55  ;;  %v3627_v56 = vld [vmem:[#allocation5 + $0x8] sm:$0xff]   ;;  %v3628_v57 = vld [vmem:[#allocation5 + $0x10] sm:$0xff]   ;;  %v3629_v58 = vld [vmem:[#allocation5 + $0x18] sm:$0xff]   ;;  %vm408_vm9 = vcmask 523264   ;;  %vm4185_vm10 = vmmov 1  }
  0x62   :  { %3558 = vmatprep.subr.bf16.mxu0 %v3624_v19  ;;  %520 = vmatpush1.bf16.msra.mxu1 %v3626_v54  ;;  %v3630_v59 = vld [vmem:[#allocation5 + $0x20] sm:$0xff]   ;;  %v3631_v60 = vld [vmem:[#allocation5 + $0x28] sm:$0xff]   ;;  %v3632_v61 = vld [vmem:[#allocation5 + $0x30] sm:$0xff]   ;;  %s4186_s3 = smov [#allocation11]  }
  0x63   :  { %v131_v2 = vadd.s32 8, %v4346_v1  ;;  %v133_v3 = vadd.s32 24, %v4346_v1  ;;  %v138_v4 = vand.u32 15, %v4346_v1  ;;  %v132_v5 = vadd.s32 16, %v4346_v1  ;;  %521 = vmatprep.subr.bf16.mxu1 %v4184_v55  ;;  %v3633_v62 = vld [vmem:[#allocation5 + $0x38] sm:$0xff]   ;;  %v3634_v63 = vld [vmem:[#allocation5 + $0x40] sm:$0xff]  }
  0x64   :  { %vm194_vm0 = vcmp.lt.s32.totalorder %v4346_v1, 1  ;;  %vm215_vm1 = vcmp.lt.s32.totalorder %v4346_v1, 7  ;;  %v3635_v0 = vld [vmem:[#allocation5 + $0x48] sm:$0xff]   ;;  %v3689_v10 = vld [vmem:[#allocation7 + $0x110] ss:$8 sps:$4 sm:$0xff]  }
  0x65   :  { %v145_v6 = vand.u32 15, %v131_v2  ;;  %v159_v7 = vand.u32 15, %v133_v3  ;;  %v121_v8 = vld [vmem:[%s4701_s23] sm:$0xff]   ;;  %v123_v9 = vld [vmem:[%s4701_s23 + $0x8] sm:$0xff]   ;;  %vm4360_vm2 = vcmp.ne.s32.totalorder %v138_v4, 0  ;;  %v152_v11 = vand.u32 15, %v132_v5  ;;  %3559 = vmatpush3.bf16.msra.mxu0 %v3624_v19 }
  0x66   :  { %v126_v12 = vunpack.c.h.bf16 %v121_v8  ;;  %v125_v13 = vunpack.c.l.bf16 %v121_v8  ;;  %v127_v14 = vunpack.c.l.bf16 %v123_v9  ;;  %v128_v17 = vunpack.c.h.bf16 %v123_v9  ;;  %246 = vrot.lane.b32.xlu0 %v121_v8, %s4177_s22  ;;  %3560 = vmatprep.subr.bf16.mxu0 %v3625_v24  ;;  %v3636_v2 = vld [vmem:[#allocation5 + $0x50] sm:$0xff]   ;;  %v3637_v3 = vld [vmem:[#allocation5 + $0x58] sm:$0xff]   ;;  %vm4480_vm11 = vmpackc.low %vm4185_vm10, %vm4360_vm2  ;;  %s3136_s23 = sshll.u32 %s4186_s3, 4  ;;  %s3137_s23 = int_to_ptr.vmem [resolvable:$true] %s3136_s23 }
  0x67   :  { %vm4367_vm3 = vcmp.ne.s32.totalorder %v145_v6, 15  ;;  %vm4371_vm4 = vcmp.ne.s32.totalorder %v159_v7, 15  ;;  %vm4382_vm5 = vcmp.ne.s32.totalorder %v152_v11, 0  ;;  %522 = vmatpush1.bf16.msra.mxu1 %v3627_v56  ;;  %v3154_v4 = vld [vmem:[#allocation2] ss:$0 sm:$0xff]  ;;  %s4142_s29 = scalar_lea.vmem %s3137_s23, 32  ;;  %p4147_p13 = scmp.lt.s32.totalorder %s3137_s23, %s3137_s23 }
  0x68   :  { %v191_v20 = vrot.slane %v126_v12, 7  ;;  %v212_v21 = vrot.slane %v126_v12, 1  ;;  %v190_v22 = vrot.slane %v125_v13, 7  ;;  %v211_v23 = vrot.slane %v125_v13, 1  ;;  %523 = vmatprep.subr.bf16.mxu1 %v4184_v55  ;;  %v3155_v6 = vld [vmem:[%s4681_s4] ss:$0 sm:$0xff]  ;;  %vm4495_vm12 = vmpackc.low %vm4185_vm10, %vm4382_vm5  ;;  %p4143_p12 = scmp.ne.s32.totalorder %s3137_s23, %s4142_s29  ;;  %p4148_p0 = scmp.lt.s32.totalorder %s4142_s29, %s4142_s29 }
  0x69   :  { %v213_v25 = vrot.slane %v127_v14, 1  ;;  %v193_v26 = vrot.slane %v128_v17, 7  ;;  %v214_v27 = vrot.slane %v128_v17, 1  ;;  %v192_v31 = vrot.slane %v127_v14, 7  ;;  %3561 = vmatpush3.bf16.msra.mxu0 %v3625_v24  ;;  %v3646_v56 = vld [vmem:[#allocation7 + $0x24] ss:$8 sps:$4 sm:$0xff]   ;;  %vm4505_vm13 = vmpackc.low %vm4367_vm3, %vm4185_vm10 }
  0x6a   :  { %v218_v29 = vsel %vm215_vm1, %v211_v23, %v212_v21  ;;  %v197_v30 = vsel %vm194_vm0, %v190_v22, %v191_v20  ;;  %248 = vrot.lane.b32.xlu0 %v123_v9, %s4177_s22  ;;  %v3703_v28 = vld [vmem:[#allocation7 + $0x154] ss:$8 sps:$4 sm:$0xff]   ;;  %vm4515_vm14 = vmpackc.low %vm4371_vm4, %vm4185_vm10  ;;  %v3743_v18 = vld [vmem:[#allocation8 + $0xa8] ss:$16 sps:$4 sm:$0xff]   ;;  %p4149_p1 = por %p4148_p0, %p4147_p13 }
  0x6b   :  { %v217_v32 = vsel %vm215_vm1, %v212_v21, %v213_v25  ;;  %v216_v33 = vsel %vm215_vm1, %v213_v25, %v214_v27  ;;  %v219_v34 = vsel %vm215_vm1, %v214_v27, %v211_v23  ;;  %v198_v35 = vsel %vm194_vm0, %v193_v26, %v190_v22  ;;  %524 = vmatpush1.bf16.msra.mxu1 %v3628_v57 }
  0x6c   :  { %v229_v36 = vsel %vm4367_vm3, %v217_v32, 0.0  ;;  %v231_v37 = vsel %vm4371_vm4, %v219_v34, 0.0  ;;  %v207_v38 = vsel %vm4360_vm2, %v198_v35, 0.0  ;;  %v195_v39 = vsel %vm194_vm0, %v192_v31, %v193_v26  ;;  %525 = vmatprep.subr.bf16.mxu1 %v4184_v55  ;;  %v3640_v34 = vld [vmem:[#allocation7 + $0x4] ss:$8 sps:$4 sm:$0xff]   ;;  %p4150_p2 = pnand %p4149_p1, %p4143_p12 }
  0x6d   :  { %v234_v40 = vpack.c.bf16 %v229_v36, %v218_v29  ;;  %v232_v41 = vpack.c.bf16 %v197_v30, %v207_v38  ;;  %v196_v42 = vsel %vm194_vm0, %v191_v20, %v192_v31  ;;  %v235_v44 = vpack.c.bf16 %v231_v37, %v216_v33  ;;  %v3638_v33 = vld [vmem:[#allocation7] ss:$8 sps:$4 sm:$0xff]   ;;  %v3643_v38 = vld [vmem:[#allocation7 + $0x14] ss:$8 sps:$4 sm:$0xff]   ;;  %912 = vmatprep.subr.bf16.mxu0 %v3640_v34 }
  0x6e   :  { %v209_v43 = vsel %vm4382_vm5, %v196_v42, 0.0  ;;  %v3716_v34 = vld [vmem:[#allocation8 + $0x20] ss:$16 sps:$4 sm:$0xff]  }
  0x6f   :  { %252 = vrot.lane.b32.xlu1 %v234_v40, %s4183_s2  ;;  %v233_v45 = vpack.c.bf16 %v195_v39, %v209_v43  ;;  %526 = vmatpush1.bf16.msra.mxu1 %v3629_v58  ;;  %v3644_v58 = vld [vmem:[#allocation7 + $0x20] ss:$8 sps:$4 sm:$0xff]  }
  0x70   :  { %527 = vmatprep.subr.bf16.mxu1 %v4184_v55 }
  0x73   :  { %254 = vrot.lane.b32.xlu1 %v235_v44, %s4183_s2  ;;  %528 = vmatpush1.bf16.msra.mxu1 %v3630_v59  ;;  %v3649_v59 = vld [vmem:[#allocation7 + $0x34] ss:$8 sps:$4 sm:$0xff]  }
  0x74   :  { %529 = vmatprep.subr.bf16.mxu1 %v4184_v55 }
  0x77   :  { %530 = vmatpush1.bf16.msra.mxu1 %v3631_v60  ;;  %v3647_v60 = vld [vmem:[#allocation7 + $0x30] ss:$8 sps:$4 sm:$0xff]  }
  0x78   :  { %531 = vmatprep.subr.bf16.mxu1 %v4184_v55 }
  0x7b   :  { %532 = vmatpush1.bf16.msra.mxu1 %v3632_v61  ;;  %v3652_v61 = vld [vmem:[#allocation7 + $0x44] ss:$8 sps:$4 sm:$0xff]  }
  0x7c   :  { %533 = vmatprep.subr.bf16.mxu1 %v4184_v55 }
  0x7f   :  { %534 = vmatpush1.bf16.msra.mxu1 %v3633_v62  ;;  %v3650_v62 = vld [vmem:[#allocation7 + $0x40] ss:$8 sps:$4 sm:$0xff]  }
  0x80   :  { %535 = vmatprep.subr.bf16.mxu1 %v4184_v55 }
  0x83   :  { %536 = vmatpush1.bf16.msra.mxu1 %v3634_v63  ;;  %v3655_v63 = vld [vmem:[#allocation7 + $0x54] ss:$8 sps:$4 sm:$0xff]  }
  0x84   :  { %537 = vmatprep.subr.bf16.mxu1 %v4184_v55 }
  0x87   :  { %538 = vmatpush1.bf16.msra.mxu1 %v3635_v0  ;;  %v3653_v0 = vld [vmem:[#allocation7 + $0x50] ss:$8 sps:$4 sm:$0xff]  }
  0x88   :  { %539 = vmatprep.subr.bf16.mxu1 %v4184_v55 }
  0x8b   :  { %540 = vmatpush1.bf16.msra.mxu1 %v3636_v2  ;;  %v3658_v2 = vld [vmem:[#allocation7 + $0x64] ss:$8 sps:$4 sm:$0xff]  }
  0x8c   :  { %541 = vmatprep.subr.bf16.mxu1 %v4184_v55 }
  0x8f   :  { %542 = vmatpush1.bf16.msra.mxu1 %v3637_v3  ;;  %v3656_v3 = vld [vmem:[#allocation7 + $0x60] ss:$8 sps:$4 sm:$0xff]  }
  0xd8   :  { %v247_v46 = vpop.permute.xlu0 %246 }
  0xd9   :  { %v259_v47 = vsel %vm256_vm6, %v232_v41, %v247_v46 }
  0xdc   :  { %v249_v48 = vpop.permute.xlu0 %248 }
  0xdd   :  { %v262_v51 = vsel %vm256_vm6, %v233_v45, %v249_v48 }
  0xe1   :  { %v253_v49 = vpop.permute.xlu1 %252 }
  0xe2   :  { %v265_v50 = vsel %vm263_vm7, %v259_v47, %v253_v49 }
  0xe3   :  { %3562 = vmatprep.mubr.msk.bf16.mxu0 %vm292_vm8, %v265_v50 }
  0xe5   :  { %v255_v52 = vpop.permute.xlu1 %254 }
  0xe6   :  { %v267_v53 = vsel %vm263_vm7, %v262_v51, %v255_v52  ;;  %v3641_v51 = vld [vmem:[#allocation7 + $0x10] ss:$8 sps:$4 sm:$0xff]  }
  0xe7   :  { %3563 = vmatmul.mubr.msk.bf16.vlgmr.msra.gmra.mrb[0].mxu0 %vm292_vm8, %v267_v53 }
  0xe8   :  { %913 = vmatpush1.bf16.msra.mxu0 %v3638_v33  ;;  %v3718_v33 = vld [vmem:[#allocation8 + $0x24] ss:$16 sps:$4 sm:$0xff]  }
  0xe9   :  { %914 = vmatprep.subr.bf16.mxu0 %v3643_v38  ;;  %v3728_v38 = vld [vmem:[#allocation8 + $0x60] ss:$16 sps:$4 sm:$0xff]  }
  0xec   :  { %915 = vmatpush1.bf16.msra.mxu0 %v3641_v51  ;;  %v3772_v51 = vld [vmem:[#allocation8 + $0x144] ss:$16 sps:$4 sm:$0xff]  }
  0xed   :  { %916 = vmatprep.subr.bf16.mxu0 %v3646_v56  ;;  %v3171_v56 = vld [vmem:[%s4684_s7] ss:$0 sm:$0xff] }
  0xf0   :  { %917 = vmatpush1.bf16.msra.mxu0 %v3644_v58 }
  0xf1   :  { %918 = vmatprep.subr.bf16.mxu0 %v3649_v59 }
  0xf4   :  { %919 = vmatpush1.bf16.msra.mxu0 %v3647_v60 }
  0xf5   :  { %920 = vmatprep.subr.bf16.mxu0 %v3652_v61 }
  0xf8   :  { %921 = vmatpush1.bf16.msra.mxu0 %v3650_v62 }
  0xf9   :  { %922 = vmatprep.subr.bf16.mxu0 %v3655_v63 }
  0xfc   :  { %923 = vmatpush1.bf16.msra.mxu0 %v3653_v0 }
  0xfd   :  { %924 = vmatprep.subr.bf16.mxu0 %v3658_v2 }
 0x100   :  { %925 = vmatpush1.bf16.msra.mxu0 %v3656_v3 }
 0x1ba   :  { %v3564_v5 = vpop.f32.mrb[0].mxu0 }
 0x1bb   :  { %v355_v7 = vmul.f32 %v3564_v5, %v3154_v4  ;;  %v331_v8 = vpop.f32.mrb[1].mxu0  ;;  %v3659_v5 = vld [vmem:[#allocation7 + $0x70] ss:$8 sps:$4 sm:$0xff]  }
 0x1bc   :  { %v353_v9 = vmul.f32 %v3154_v4, %v331_v8  ;;  %v3565_v11 = vpop.f32.mrb[2].mxu0  ;;  %v3667_v8 = vld [vmem:[#allocation7 + $0x94] ss:$8 sps:$4 sm:$0xff]  }
 0x1bd   :  { %v366_v12 = vadd.f32 %v3155_v6, %v355_v7  ;;  %v356_v13 = vmul.f32 %v3565_v11, %v3154_v4  ;;  %v334_v14 = vpop.f32.mrb[3].mxu0  ;;  %v3662_v7 = vld [vmem:[#allocation7 + $0x80] ss:$8 sps:$4 sm:$0xff]   ;;  %v3670_v11 = vld [vmem:[#allocation7 + $0xa4] ss:$8 sps:$4 sm:$0xff]  }
 0x1be   :  { %v364_v15 = vadd.f32 %v3155_v6, %v353_v9  ;;  %v354_v17 = vmul.f32 %v3154_v4, %v334_v14  ;;  %v3661_v4 = vld [vmem:[#allocation7 + $0x74] ss:$8 sps:$4 sm:$0xff]   ;;  %v3665_v9 = vld [vmem:[#allocation7 + $0x90] ss:$8 sps:$4 sm:$0xff]  }
 0x1bf   :  { %v370_v19 = vmax.f32 %v366_v12, 0.0  ;;  %v367_v20 = vadd.f32 %v3155_v6, %v356_v13  ;;  %926 = vmatprep.subr.bf16.mxu0 %v3661_v4  ;;  %v3668_v12 = vld [vmem:[#allocation7 + $0xa0] ss:$8 sps:$4 sm:$0xff]  }
 0x1c0   :  { %v368_v21 = vmax.f32 %v364_v15, 0.0  ;;  %v365_v22 = vadd.f32 %v3155_v6, %v354_v17  ;;  %v3664_v6 = vld [vmem:[#allocation7 + $0x84] ss:$8 sps:$4 sm:$0xff]   ;;  %927 = vmatpush1.bf16.msra.mxu0 %v3659_v5 }
 0x1c1   :  { %v374_v23 = vrot.slane %v370_v19, 7  ;;  %v371_v24 = vmax.f32 %v367_v20, 0.0  ;;  %v386_v25 = vrot.slane %v370_v19, 1  ;;  %928 = vmatprep.subr.bf16.mxu0 %v3664_v6  ;;  %v3671_v20 = vld [vmem:[#allocation7 + $0xb0] ss:$8 sps:$4 sm:$0xff]  }
 0x1c2   :  { %v372_v26 = vrot.slane %v368_v21, 7  ;;  %v369_v27 = vmax.f32 %v365_v22, 0.0  ;;  %v384_v29 = vrot.slane %v368_v21, 1  ;;  %v3674_v22 = vld [vmem:[#allocation7 + $0xc0] ss:$8 sps:$4 sm:$0xff]  }
 0x1c3   :  { %v375_v30 = vrot.slane %v371_v24, 7  ;;  %v387_v31 = vrot.slane %v371_v24, 1  ;;  %v399_v32 = vpack.c.bf16 %v371_v24, %v370_v19  ;;  %v3673_v19 = vld [vmem:[#allocation7 + $0xb4] ss:$8 sps:$4 sm:$0xff]   ;;  %v3677_v24 = vld [vmem:[#allocation7 + $0xd0] ss:$8 sps:$4 sm:$0xff]  }
 0x1c4   :  { %v373_v35 = vrot.slane %v369_v27, 7  ;;  %v398_v36 = vpack.c.bf16 %v369_v27, %v368_v21  ;;  %v385_v37 = vrot.slane %v369_v27, 1  ;;  %929 = vmatpush1.bf16.msra.mxu0 %v3662_v7  ;;  %v3676_v21 = vld [vmem:[#allocation7 + $0xc4] ss:$8 sps:$4 sm:$0xff]   ;;  %v3685_v27 = vld [vmem:[#allocation7 + $0xf4] ss:$8 sps:$4 sm:$0xff]  }
 0x1c5   :  { %406 = vrot.lane.b32.xlu1 %v399_v32, %s4700_s25  ;;  %v379_v39 = vsel %vm194_vm0, %v375_v30, %v372_v26  ;;  %v388_v40 = vsel %vm215_vm1, %v386_v25, %v387_v31  ;;  %v391_v41 = vsel %vm215_vm1, %v387_v31, %v384_v29  ;;  %v376_v42 = vsel %vm194_vm0, %v374_v23, %v375_v30  ;;  %v3688_v30 = vld [vmem:[#allocation7 + $0x104] ss:$8 sps:$4 sm:$0xff]   ;;  %v3710_v31 = vld [vmem:[#allocation8] ss:$16 sps:$4 sm:$0xff]  }
 0x1c6   :  { %404 = vrot.lane.b32.xlu0 %v398_v36, %s4700_s25  ;;  %v389_v43 = vsel %vm215_vm1, %v385_v37, %v386_v25  ;;  %v390_v44 = vsel %vm215_vm1, %v384_v29, %v385_v37  ;;  %v378_v45 = vsel %vm194_vm0, %v372_v26, %v373_v35  ;;  %v380_v46 = vsel %vm4360_vm2, %v379_v39, 0.0  ;;  %930 = vmatprep.subr.bf16.mxu0 %v3667_v8  ;;  %v3682_v25 = vld [vmem:[#allocation7 + $0xe4] ss:$8 sps:$4 sm:$0xff]   ;;  %v3680_v26 = vld [vmem:[#allocation7 + $0xe0] ss:$8 sps:$4 sm:$0xff]  }
 0x1c7   :  { %v393_v47 = vsel %vm4367_vm3, %v389_v43, 0.0  ;;  %v396_v48 = vpack.c.bf16 %v378_v45, %v380_v46  ;;  %v395_v49 = vsel %vm4371_vm4, %v391_v41, 0.0  ;;  %v377_v50 = vsel %vm194_vm0, %v373_v35, %v374_v23  ;;  %v3679_v23 = vld [vmem:[#allocation7 + $0xd4] ss:$8 sps:$4 sm:$0xff]   ;;  %v3683_v29 = vld [vmem:[#allocation7 + $0xf0] ss:$8 sps:$4 sm:$0xff]  }
 0x1c8   :  { %v400_v52 = vpack.c.bf16 %v393_v47, %v390_v44  ;;  %v401_v53 = vpack.c.bf16 %v395_v49, %v388_v40  ;;  %v382_v54 = vsel %vm4382_vm5, %v377_v50, 0.0  ;;  %931 = vmatpush1.bf16.msra.mxu0 %v3665_v9  ;;  %v3712_v32 = vld [vmem:[#allocation8 + $0x4] ss:$16 sps:$4 sm:$0xff]   ;;  %v3722_v36 = vld [vmem:[#allocation8 + $0x40] ss:$16 sps:$4 sm:$0xff]  }
 0x1c9   :  { %v397_v57 = vpack.c.bf16 %v376_v42, %v382_v54  ;;  %932 = vmatprep.subr.bf16.mxu0 %v3670_v11  ;;  %2278 = vmatprep.subr.bf16.mxu1 %v3712_v32  ;;  %v3724_v35 = vld [vmem:[#allocation8 + $0x44] ss:$16 sps:$4 sm:$0xff]   ;;  %v3734_v40 = vld [vmem:[#allocation8 + $0x80] ss:$16 sps:$4 sm:$0xff]  }
 0x1ca   :  { %3168 = vmatprep.mubr.msk.bf16.mxu1 %vm408_vm9, %v400_v52  ;;  %v3730_v37 = vld [vmem:[#allocation8 + $0x64] ss:$16 sps:$4 sm:$0xff]   ;;  %v3740_v42 = vld [vmem:[#allocation8 + $0xa0] ss:$16 sps:$4 sm:$0xff]  }
 0x1cb   :  { %v3736_v39 = vld [vmem:[#allocation8 + $0x84] ss:$16 sps:$4 sm:$0xff]   ;;  %v3746_v44 = vld [vmem:[#allocation8 + $0xc0] ss:$16 sps:$4 sm:$0xff]  }
 0x1cc   :  { %933 = vmatpush1.bf16.msra.mxu0 %v3668_v12  ;;  %v3742_v41 = vld [vmem:[#allocation8 + $0xa4] ss:$16 sps:$4 sm:$0xff]   ;;  %v3752_v46 = vld [vmem:[#allocation8 + $0xe0] ss:$16 sps:$4 sm:$0xff]  }
 0x1cd   :  { %934 = vmatprep.subr.bf16.mxu0 %v3673_v19  ;;  %v3748_v43 = vld [vmem:[#allocation8 + $0xc4] ss:$16 sps:$4 sm:$0xff]   ;;  %v3764_v50 = vld [vmem:[#allocation8 + $0x120] ss:$16 sps:$4 sm:$0xff]  }
 0x1ce   :  { %v3754_v45 = vld [vmem:[#allocation8 + $0xe4] ss:$16 sps:$4 sm:$0xff]   ;;  %v3770_v52 = vld [vmem:[#allocation8 + $0x140] ss:$16 sps:$4 sm:$0xff]  }
 0x1cf   :  { %v3760_v47 = vld [vmem:[#allocation8 + $0x104] ss:$16 sps:$4 sm:$0xff]  }
 0x1d0   :  { %935 = vmatpush1.bf16.msra.mxu0 %v3671_v20  ;;  %v3766_v49 = vld [vmem:[#allocation8 + $0x124] ss:$16 sps:$4 sm:$0xff]  }
 0x1d1   :  { %936 = vmatprep.subr.bf16.mxu0 %v3676_v21 }
 0x1d4   :  { %937 = vmatpush1.bf16.msra.mxu0 %v3674_v22 }
 0x1d5   :  { %938 = vmatprep.subr.bf16.mxu0 %v3679_v23 }
 0x1d8   :  { %939 = vmatpush1.bf16.msra.mxu0 %v3677_v24 }
 0x1d9   :  { %940 = vmatprep.subr.bf16.mxu0 %v3682_v25 }
 0x1dc   :  { %941 = vmatpush1.bf16.msra.mxu0 %v3680_v26 }
 0x1dd   :  { %942 = vmatprep.subr.bf16.mxu0 %v3685_v27 }
 0x1e0   :  { %943 = vmatpush1.bf16.msra.mxu0 %v3683_v29 }
 0x1e1   :  { %965 = vmatprep.subr.bf16.mxu0 %v3688_v30 }
 0x237   :  { %v407_v15 = vpop.permute.xlu1 %406 }
 0x238   :  { %v405_v13 = vpop.permute.xlu0 %404  ;;  %v415_v17 = vsel %vm408_vm9, %v397_v57, %v407_v15 }
 0x239   :  { %v411_v14 = vsel %vm408_vm9, %v396_v48, %v405_v13  ;;  %v3758_v48 = vld [vmem:[#allocation8 + $0x100] ss:$16 sps:$4 sm:$0xff]  }
 0x23a   :  { %552 = vmatmul.mubr.bf16.vlgmr.msra.gmra.mrb[0].mxu1 %v411_v14 }
 0x23b   :  { %3169 = vmatprep.mubr.msk.bf16.mxu1 %vm408_vm9, %v401_v53  ;;  %2279 = vmatpush1.bf16.msra.mxu1 %v3710_v31  ;;  %v3170_v53 = vld [vmem:[%s4683_s6] ss:$0 sm:$0xff] }
 0x23c   :  { %2280 = vmatprep.subr.bf16.mxu1 %v3718_v33  ;;  %v3686_v33 = vld [vmem:[#allocation7 + $0x100] ss:$8 sps:$4 sm:$0xff]  }
 0x23f   :  { %2281 = vmatpush1.bf16.msra.mxu1 %v3716_v34  ;;  %v3826_v34 = vld [vmem:[#allocation8 + $0x264] ss:$16 sps:$4 sm:$0xff]  }
 0x240   :  { %2282 = vmatprep.subr.bf16.mxu1 %v3724_v35 }
 0x242   :  { %560 = vmatmul.mubr.bf16.gmra.mrb[4].mxu1 %v415_v17 }
 0x243   :  { %2283 = vmatpush1.bf16.msra.mxu1 %v3722_v36 }
 0x244   :  { %2284 = vmatprep.subr.bf16.mxu1 %v3730_v37 }
 0x247   :  { %2285 = vmatpush1.bf16.msra.mxu1 %v3728_v38 }
 0x248   :  { %2286 = vmatprep.subr.bf16.mxu1 %v3736_v39  ;;  %v3691_v39 = vld [vmem:[#allocation7 + $0x114] ss:$8 sps:$4 sm:$0xff]  }
 0x24b   :  { %2287 = vmatpush1.bf16.msra.mxu1 %v3734_v40 }
 0x24c   :  { %2288 = vmatprep.subr.bf16.mxu1 %v3742_v41 }
 0x24f   :  { %2289 = vmatpush1.bf16.msra.mxu1 %v3740_v42  ;;  %v3694_v42 = vld [vmem:[#allocation7 + $0x124] ss:$8 sps:$4 sm:$0xff]  }
 0x250   :  { %2290 = vmatprep.subr.bf16.mxu1 %v3748_v43  ;;  %v3692_v43 = vld [vmem:[#allocation7 + $0x120] ss:$8 sps:$4 sm:$0xff]  }
 0x253   :  { %2291 = vmatpush1.bf16.msra.mxu1 %v3746_v44  ;;  %v3838_v44 = vld [vmem:[#allocation8 + $0x2a4] ss:$16 sps:$4 sm:$0xff]  }
 0x254   :  { %2292 = vmatprep.subr.bf16.mxu1 %v3754_v45  ;;  %v3697_v45 = vld [vmem:[#allocation7 + $0x134] ss:$8 sps:$4 sm:$0xff]  }
 0x257   :  { %2293 = vmatpush1.bf16.msra.mxu1 %v3752_v46  ;;  %v3695_v46 = vld [vmem:[#allocation7 + $0x130] ss:$8 sps:$4 sm:$0xff]  }
 0x258   :  { %2294 = vmatprep.subr.bf16.mxu1 %v3760_v47  ;;  %v3700_v47 = vld [vmem:[#allocation7 + $0x144] ss:$8 sps:$4 sm:$0xff]  }
 0x25b   :  { %2295 = vmatpush1.bf16.msra.mxu1 %v3758_v48  ;;  %v3698_v48 = vld [vmem:[#allocation7 + $0x140] ss:$8 sps:$4 sm:$0xff]  }
 0x25c   :  { %2296 = vmatprep.subr.bf16.mxu1 %v3766_v49  ;;  %v3701_v49 = vld [vmem:[#allocation7 + $0x150] ss:$8 sps:$4 sm:$0xff]  }
 0x25f   :  { %2297 = vmatpush1.bf16.msra.mxu1 %v3764_v50  ;;  %v3706_v50 = vld [vmem:[#allocation7 + $0x164] ss:$8 sps:$4 sm:$0xff]  }
 0x260   :  { %2298 = vmatprep.subr.bf16.mxu1 %v3772_v51  ;;  %v3704_v51 = vld [vmem:[#allocation7 + $0x160] ss:$8 sps:$4 sm:$0xff]  }
 0x263   :  { %2299 = vmatpush1.bf16.msra.mxu1 %v3770_v52  ;;  %v3709_v52 = vld [vmem:[#allocation7 + $0x174] ss:$8 sps:$4 sm:$0xff]  }
 0x30d   :  { %v553_v54 = vpop.f32.mrb[0].mxu1 }
 0x30e   :  { %v575_v57 = vmul.f32 %v3170_v53, %v553_v54  ;;  %v555_v58 = vpop.f32.mrb[1].mxu1  ;;  %v3715_v54 = vld [vmem:[#allocation8 + $0xc] ss:$16 sps:$4 sm:$0xff]  }
 0x30f   :  { %v556_v59 = vpop.f32.mrb[2].mxu1  ;;  %v3721_v58 = vld [vmem:[#allocation8 + $0x2c] ss:$16 sps:$4 sm:$0xff]  }
 0x310   :  { %v586_v60 = vadd.f32 %v3171_v56, %v575_v57  ;;  %v576_v61 = vmul.f32 %v3170_v53, %v556_v59  ;;  %v558_v62 = vpop.f32.mrb[3].mxu1  ;;  %v3713_v57 = vld [vmem:[#allocation8 + $0x8] ss:$16 sps:$4 sm:$0xff]  }
 0x311   :  { %v3719_v59 = vld [vmem:[#allocation8 + $0x28] ss:$16 sps:$4 sm:$0xff]   ;;  %v3733_v62 = vld [vmem:[#allocation8 + $0x6c] ss:$16 sps:$4 sm:$0xff]  }
 0x312   :  { %v590_v63 = vmax.f32 %v586_v60, 0.0  ;;  %v587_v0 = vadd.f32 %v3171_v56, %v576_v61  ;;  %v3727_v60 = vld [vmem:[#allocation8 + $0x4c] ss:$16 sps:$4 sm:$0xff]   ;;  %v3725_v61 = vld [vmem:[#allocation8 + $0x48] ss:$16 sps:$4 sm:$0xff]  }
 0x314   :  { %v591_v2 = vmax.f32 %v587_v0, 0.0  ;;  %v594_v3 = vrot.slane %v590_v63, 7  ;;  %v606_v4 = vrot.slane %v590_v63, 1  ;;  %v3739_v0 = vld [vmem:[#allocation8 + $0x8c] ss:$16 sps:$4 sm:$0xff]  }
 0x315   :  { %v561_v5 = vpop.f32.mrb[4].mxu1 }
 0x316   :  { %v595_v6 = vrot.slane %v591_v2, 7  ;;  %v607_v7 = vrot.slane %v591_v2, 1  ;;  %v577_v8 = vmul.f32 %v3170_v53, %v561_v5  ;;  %v563_v9 = vpop.f32.mrb[5].mxu1  ;;  %v620_v11 = vpack.c.bf16 %v591_v2, %v590_v63  ;;  %v3731_v63 = vld [vmem:[#allocation8 + $0x68] ss:$16 sps:$4 sm:$0xff]  }
 0x317   :  { %v564_v12 = vpop.f32.mrb[6].mxu1  ;;  %v3737_v2 = vld [vmem:[#allocation8 + $0x88] ss:$16 sps:$4 sm:$0xff]  }
 0x318   :  { %v600_v13 = vsel %vm194_vm0, %v594_v3, %v595_v6  ;;  %v4468_v14 = vsel %vm215_vm1, %v606_v4, %v607_v7  ;;  %v588_v15 = vadd.f32 %v3171_v56, %v577_v8  ;;  %v578_v17 = vmul.f32 %v3170_v53, %v564_v12  ;;  %v566_v19 = vpop.f32.mrb[7].mxu1  ;;  %944 = vmatprep.mubr.bf16.mxu0 %v620_v11  ;;  %v3707_v53 = vld [vmem:[#allocation7 + $0x170] ss:$8 sps:$4 sm:$0xff]   ;;  %v3763_v8 = vld [vmem:[#allocation8 + $0x10c] ss:$16 sps:$4 sm:$0xff]  }
 0x319   :  { %v3749_v5 = vld [vmem:[#allocation8 + $0xc8] ss:$16 sps:$4 sm:$0xff]   ;;  %v3769_v11 = vld [vmem:[#allocation8 + $0x12c] ss:$16 sps:$4 sm:$0xff]   ;;  %v3776_v19 = vld [vmem:[#allocation8 + $0x160] ss:$16 sps:$4 sm:$0xff]  }
 0x31a   :  { %v592_v20 = vmax.f32 %v588_v15, 0.0  ;;  %v589_v21 = vadd.f32 %v3171_v56, %v578_v17  ;;  %v3761_v9 = vld [vmem:[#allocation8 + $0x108] ss:$16 sps:$4 sm:$0xff]   ;;  %v3778_v15 = vld [vmem:[#allocation8 + $0x164] ss:$16 sps:$4 sm:$0xff]  }
 0x31b   :  { %v3767_v12 = vld [vmem:[#allocation8 + $0x128] ss:$16 sps:$4 sm:$0xff]   ;;  %v3781_v17 = vld [vmem:[#allocation8 + $0x16c] ss:$16 sps:$4 sm:$0xff]   ;;  %2300 = vmatprep.subr.bf16.mxu1 %v3778_v15 }
 0x31c   :  { %v596_v22 = vrot.slane %v592_v20, 7  ;;  %v608_v23 = vrot.slane %v592_v20, 1  ;;  %v593_v24 = vmax.f32 %v589_v21, 0.0  ;;  %2301 = vmatpush1.bf16.msra.mxu1 %v3776_v19  ;;  %v3784_v21 = vld [vmem:[#allocation8 + $0x184] ss:$16 sps:$4 sm:$0xff]  }
 0x31d   :  { %2302 = vmatprep.subr.bf16.mxu1 %v3784_v21  ;;  %v2596_v56 = vld [vmem:[%s4689_s12] sm:$0xf] }
 0x31e   :  { %v611_v25 = vsel %vm215_vm1, %v607_v7, %v608_v23  ;;  %v597_v26 = vrot.slane %v593_v24, 7  ;;  %v609_v27 = vrot.slane %v593_v24, 1  ;;  %v621_v29 = vpack.c.bf16 %v593_v24, %v592_v20  ;;  %v3755_v7 = vld [vmem:[#allocation8 + $0xe8] ss:$16 sps:$4 sm:$0xff]  }
 0x31f   :  { %v3227_v30 = vpack.c.bf16 %v611_v25, %v4468_v14  ;;  %v599_v31 = vsel %vm194_vm0, %v595_v6, %v596_v22  ;;  %v3757_v6 = vld [vmem:[#allocation8 + $0xec] ss:$16 sps:$4 sm:$0xff]   ;;  %v3773_v14 = vld [vmem:[#allocation8 + $0x148] ss:$16 sps:$4 sm:$0xff]   ;;  %v3790_v25 = vld [vmem:[#allocation8 + $0x1a4] ss:$16 sps:$4 sm:$0xff]  }
 0x320   :  { %v601_v32 = vsel %vm194_vm0, %v597_v26, %v594_v3  ;;  %v598_v35 = vsel %vm194_vm0, %v596_v22, %v597_v26  ;;  %v610_v36 = vsel %vm215_vm1, %v608_v23, %v609_v27  ;;  %v613_v37 = vsel %vm215_vm1, %v609_v27, %v606_v4  ;;  %v3745_v3 = vld [vmem:[#allocation8 + $0xac] ss:$16 sps:$4 sm:$0xff]   ;;  %v3779_v20 = vld [vmem:[#allocation8 + $0x168] ss:$16 sps:$4 sm:$0xff]   ;;  %v3782_v23 = vld [vmem:[#allocation8 + $0x180] ss:$16 sps:$4 sm:$0xff]  }
 0x321   :  { %v3221_v38 = vpack.c.bf16 %v600_v13, %v601_v32  ;;  %v3224_v40 = vpack.c.bf16 %v598_v35, %v599_v31  ;;  %v3230_v41 = vpack.c.bf16 %v613_v37, %v610_v36  ;;  %v3751_v4 = vld [vmem:[#allocation8 + $0xcc] ss:$16 sps:$4 sm:$0xff]   ;;  %v3785_v24 = vld [vmem:[#allocation8 + $0x188] ss:$16 sps:$4 sm:$0xff]   ;;  %2303 = vmatpush1.bf16.msra.mxu1 %v3782_v23  ;;  %v3788_v27 = vld [vmem:[#allocation8 + $0x1a0] ss:$16 sps:$4 sm:$0xff]  }
 0x322   :  { %v3775_v13 = vld [vmem:[#allocation8 + $0x14c] ss:$16 sps:$4 sm:$0xff]   ;;  %2304 = vmatprep.subr.bf16.mxu1 %v3790_v25  ;;  %v3794_v32 = vld [vmem:[#allocation8 + $0x1c0] ss:$16 sps:$4 sm:$0xff]   ;;  %v3802_v35 = vld [vmem:[#allocation8 + $0x1e4] ss:$16 sps:$4 sm:$0xff]  }
 0x323   :  { %3222 = vmatmul.mubr.msk.bf16.vlgmr.msra.gmra.mrb[4].mxu0 %vm4480_vm11, %v3221_v38  ;;  %v3787_v22 = vld [vmem:[#allocation8 + $0x18c] ss:$16 sps:$4 sm:$0xff]   ;;  %v3800_v37 = vld [vmem:[#allocation8 + $0x1e0] ss:$16 sps:$4 sm:$0xff]   ;;  %v3803_v38 = vld [vmem:[#allocation8 + $0x1e8] ss:$16 sps:$4 sm:$0xff]  }
 0x324   :  { %966 = vmatpush1.bf16.msra.mxu0 %v3686_v33  ;;  %954 = vmatprep.mubr.bf16.mxu0 %v621_v29  ;;  %v3793_v26 = vld [vmem:[#allocation8 + $0x1ac] ss:$16 sps:$4 sm:$0xff]   ;;  %v3791_v29 = vld [vmem:[#allocation8 + $0x1a8] ss:$16 sps:$4 sm:$0xff]  }
 0x325   :  { %967 = vmatprep.subr.bf16.mxu0 %v3691_v39  ;;  %2305 = vmatpush1.bf16.msra.mxu1 %v3788_v27  ;;  %v3799_v31 = vld [vmem:[#allocation8 + $0x1cc] ss:$16 sps:$4 sm:$0xff]   ;;  %v3797_v33 = vld [vmem:[#allocation8 + $0x1c8] ss:$16 sps:$4 sm:$0xff]   ;;  %v3808_v39 = vld [vmem:[#allocation8 + $0x204] ss:$16 sps:$4 sm:$0xff]  }
 0x326   :  { %v3805_v36 = vld [vmem:[#allocation8 + $0x1ec] ss:$16 sps:$4 sm:$0xff]  }
 0x328   :  { %968 = vmatpush1.bf16.msra.mxu0 %v3689_v10  ;;  %v1018_v10 = vld [vmem:[%s4686_s9] sm:$0x3] }
 0x329   :  { %969 = vmatprep.subr.bf16.mxu0 %v3694_v42  ;;  %v4528_v42 = vsub.s32 1, %v4346_v1 }
 0x32b   :  { %3225 = vmatmul.mubr.msk.bf16.gmra.mrb[8].mxu0 %vm4495_vm12, %v3224_v40  ;;  %v3811_v40 = vld [vmem:[#allocation8 + $0x20c] ss:$16 sps:$4 sm:$0xff]  }
 0x32c   :  { %970 = vmatpush1.bf16.msra.mxu0 %v3692_v43  ;;  %997 = vmatprep.mubr.bf16.mxu0 %v4184_v55  ;;  %v1038_v43 = vld [vmem:[%s4687_s10] sm:$0x3] }
 0x32d   :  { %971 = vmatprep.subr.bf16.mxu0 %v3697_v45 }
 0x330   :  { %972 = vmatpush1.bf16.msra.mxu0 %v3695_v46  ;;  %v1027_v46 = vrot.slane %v1018_v10, %v4528_v42 }
 0x331   :  { %973 = vmatprep.subr.bf16.mxu0 %v3700_v47 }
 0x334   :  { %974 = vmatpush1.bf16.msra.mxu0 %v3698_v48 }
 0x335   :  { %975 = vmatprep.subr.bf16.mxu0 %v3703_v28  ;;  %v1047_v28 = vrot.slane %v1038_v43, %v4528_v42 }
 0x338   :  { %976 = vmatpush1.bf16.msra.mxu0 %v3701_v49 }
 0x339   :  { %977 = vmatprep.subr.bf16.mxu0 %v3706_v50 }
 0x33c   :  { %978 = vmatpush1.bf16.msra.mxu0 %v3704_v51 }
 0x33d   :  { %979 = vmatprep.subr.bf16.mxu0 %v3709_v52 }
 0x340   :  { %980 = vmatpush1.bf16.msra.mxu0 %v3707_v53 }
 0x341   :  { %2437 = vmatprep.subr.bf16.mxu0 %v3715_v54 }
 0x343   :  { %3228 = vmatmul.mubr.msk.bf16.vlgmr.msra.gmra.mrb[4].mxu0 %vm4505_vm13, %v3227_v30  ;;  %v3796_v30 = vld [vmem:[#allocation8 + $0x1c4] ss:$16 sps:$4 sm:$0xff]  }
 0x344   :  { %1007 = vmatprep.mubr.bf16.mxu0 %v4184_v55  ;;  %2438 = vmatpush1.bf16.msra.mxu0 %v3713_v57 }
 0x345   :  { %2439 = vmatprep.subr.bf16.mxu0 %v3721_v58  ;;  %2306 = vmatprep.subr.bf16.mxu1 %v3796_v30 }
 0x346   :  { %2307 = vmatpush1.bf16.msra.mxu1 %v3794_v32 }
 0x347   :  { %2308 = vmatprep.subr.bf16.mxu1 %v3802_v35 }
 0x348   :  { %2440 = vmatpush1.bf16.msra.mxu0 %v3719_v59 }
 0x349   :  { %2441 = vmatprep.subr.bf16.mxu0 %v3727_v60 }
 0x34a   :  { %2309 = vmatpush1.bf16.msra.mxu1 %v3800_v37 }
 0x34b   :  { %3231 = vmatmul.mubr.msk.bf16.gmra.mrb[8].mxu0 %vm4515_vm14, %v3230_v41  ;;  %2331 = vmatprep.subr.bf16.mxu1 %v3808_v39  ;;  %v4522_v41 = vsub.s32 0, %v4346_v1 }
 0x34c   :  { %2442 = vmatpush1.bf16.msra.mxu0 %v3725_v61 }
 0x34d   :  { %2443 = vmatprep.subr.bf16.mxu0 %v3733_v62  ;;  %v1023_v45 = vrot.slane %v1018_v10, %v4522_v41  ;;  %v1043_v47 = vrot.slane %v1038_v43, %v4522_v41 }
 0x350   :  { %2444 = vmatpush1.bf16.msra.mxu0 %v3731_v63 }
 0x351   :  { %2445 = vmatprep.subr.bf16.mxu0 %v3739_v0 }
 0x354   :  { %2446 = vmatpush1.bf16.msra.mxu0 %v3737_v2 }
 0x355   :  { %2447 = vmatprep.subr.bf16.mxu0 %v3745_v3 }
 0x358   :  { %2448 = vmatpush1.bf16.msra.mxu0 %v3743_v18 }
 0x359   :  { %2449 = vmatprep.subr.bf16.mxu0 %v3751_v4 }
 0x35c   :  { %2450 = vmatpush1.bf16.msra.mxu0 %v3749_v5 }
 0x35d   :  { %2451 = vmatprep.subr.bf16.mxu0 %v3757_v6 }
 0x360   :  { %2452 = vmatpush1.bf16.msra.mxu0 %v3755_v7 }
 0x361   :  { %2453 = vmatprep.subr.bf16.mxu0 %v3763_v8 }
 0x364   :  { %2454 = vmatpush1.bf16.msra.mxu0 %v3761_v9 }
 0x365   :  { %2455 = vmatprep.subr.bf16.mxu0 %v3769_v11 }
 0x368   :  { %2456 = vmatpush1.bf16.msra.mxu0 %v3767_v12 }
 0x369   :  { %2457 = vmatprep.subr.bf16.mxu0 %v3775_v13 }
 0x36c   :  { %2458 = vmatpush1.bf16.msra.mxu0 %v3773_v14 }
 0x36d   :  { %2459 = vmatprep.subr.bf16.mxu0 %v3781_v17 }
 0x370   :  { %2460 = vmatpush1.bf16.msra.mxu0 %v3779_v20 }
 0x371   :  { %2461 = vmatprep.subr.bf16.mxu0 %v3787_v22 }
 0x374   :  { %2462 = vmatpush1.bf16.msra.mxu0 %v3785_v24 }
 0x375   :  { %2463 = vmatprep.subr.bf16.mxu0 %v3793_v26 }
 0x378   :  { %2464 = vmatpush1.bf16.msra.mxu0 %v3791_v29 }
 0x379   :  { %2465 = vmatprep.subr.bf16.mxu0 %v3799_v31 }
 0x37c   :  { %2466 = vmatpush1.bf16.msra.mxu0 %v3797_v33 }
 0x37d   :  { %2467 = vmatprep.subr.bf16.mxu0 %v3805_v36 }
 0x380   :  { %2468 = vmatpush1.bf16.msra.mxu0 %v3803_v38 }
 0x381   :  { %2490 = vmatprep.subr.bf16.mxu0 %v3811_v40 }
 0x416   :  { %v999_v48 = vpop.f32.mrb[4].mxu0 }
 0x417   :  { %v1030_v49 = vmul.f32 %v1023_v45, %v999_v48  ;;  %v1001_v50 = vpop.f32.mrb[5].mxu0 }
 0x418   :  { %v1031_v51 = vmul.f32 %v1027_v46, %v1001_v50  ;;  %v1003_v52 = vpop.f32.mrb[6].mxu0 }
 0x419   :  { %v1050_v53 = vadd.f32 %v1043_v47, %v1030_v49  ;;  %v1032_v54 = vmul.f32 %v1023_v45, %v1003_v52  ;;  %v1005_v57 = vpop.f32.mrb[7].mxu0 }
 0x41a   :  { %v1051_v58 = vadd.f32 %v1047_v28, %v1031_v51  ;;  %v1033_v59 = vmul.f32 %v1027_v46, %v1005_v57 }
 0x41b   :  { %v4537_v60 = vmax.f32 %v1050_v53, 0.0  ;;  %v1052_v61 = vadd.f32 %v1043_v47, %v1032_v54 }
 0x41c   :  { %v4539_v62 = vmax.f32 %v1051_v58, 0.0  ;;  %v1053_v63 = vadd.f32 %v1047_v28, %v1033_v59 }
 0x41d   :  { %v1066_v0 = vrot.slane %v4537_v60, 7  ;;  %v1060_v2 = vmax.f32 %v1052_v61, 0.0  ;;  %v1090_v3 = vrot.slane %v4537_v60, 1  ;;  %v3806_v61 = vld [vmem:[#allocation8 + $0x200] ss:$16 sps:$4 sm:$0xff]  }
 0x41e   :  { %v1067_v18 = vrot.slane %v4539_v62, 7  ;;  %v1091_v4 = vrot.slane %v4539_v62, 1  ;;  %v1061_v5 = vmax.f32 %v1053_v63, 0.0  ;;  %v1009_v6 = vpop.f32.mrb[8].mxu0 }
 0x41f   :  { %v1068_v7 = vrot.slane %v1060_v2, 7  ;;  %v1092_v8 = vrot.slane %v1060_v2, 1  ;;  %v4546_v9 = vpack.c.bf16 %v1060_v2, %v4537_v60  ;;  %v1034_v11 = vmul.f32 %v1023_v45, %v1009_v6  ;;  %v1011_v12 = vpop.f32.mrb[9].mxu0 }
 0x420   :  { %v1069_v13 = vrot.slane %v1061_v5, 7  ;;  %v1093_v14 = vrot.slane %v1061_v5, 1  ;;  %v1035_v15 = vmul.f32 %v1027_v46, %v1011_v12  ;;  %v1013_v17 = vpop.f32.mrb[10].mxu0  ;;  %v4549_v19 = vpack.c.bf16 %v1061_v5, %v4539_v62  ;;  %v3809_v62 = vld [vmem:[#allocation8 + $0x208] ss:$16 sps:$4 sm:$0xff]  }
 0x421   :  { %v1078_v20 = vsel %vm194_vm0, %v1066_v0, %v1068_v7  ;;  %v1102_v21 = vsel %vm215_vm1, %v1090_v3, %v1092_v8  ;;  %v1054_v22 = vadd.f32 %v1043_v47, %v1034_v11  ;;  %v1036_v23 = vmul.f32 %v1023_v45, %v1013_v17  ;;  %v1015_v24 = vpop.f32.mrb[11].mxu0  ;;  %v3817_v11 = vld [vmem:[#allocation8 + $0x22c] ss:$16 sps:$4 sm:$0xff]   ;;  %v3818_v17 = vld [vmem:[#allocation8 + $0x240] ss:$16 sps:$4 sm:$0xff]  }
 0x422   :  { %v1055_v25 = vadd.f32 %v1047_v28, %v1035_v15  ;;  %v1037_v26 = vmul.f32 %v1027_v46, %v1015_v24  ;;  %v1079_v27 = vsel %vm194_vm0, %v1067_v18, %v1069_v13  ;;  %v1103_v29 = vsel %vm215_vm1, %v1091_v4, %v1093_v14  ;;  %v3823_v15 = vld [vmem:[#allocation8 + $0x24c] ss:$16 sps:$4 sm:$0xff]   ;;  %v3832_v24 = vld [vmem:[#allocation8 + $0x284] ss:$16 sps:$4 sm:$0xff]  }
 0x423   :  { %v1062_v30 = vmax.f32 %v1054_v22, 0.0  ;;  %v1056_v31 = vadd.f32 %v1043_v47, %v1036_v23  ;;  %v3824_v22 = vld [vmem:[#allocation8 + $0x260] ss:$16 sps:$4 sm:$0xff]   ;;  %v3827_v23 = vld [vmem:[#allocation8 + $0x268] ss:$16 sps:$4 sm:$0xff]  }
 0x424   :  { %v1063_v32 = vmax.f32 %v1055_v25, 0.0  ;;  %v1057_v33 = vadd.f32 %v1047_v28, %v1037_v26  ;;  %v3835_v25 = vld [vmem:[#allocation8 + $0x28c] ss:$16 sps:$4 sm:$0xff]   ;;  %v3830_v26 = vld [vmem:[#allocation8 + $0x280] ss:$16 sps:$4 sm:$0xff]  }
 0x425   :  { %v1070_v35 = vrot.slane %v1062_v30, 7  ;;  %v1094_v36 = vrot.slane %v1062_v30, 1  ;;  %v1064_v37 = vmax.f32 %v1056_v31, 0.0  ;;  %v3839_v31 = vld [vmem:[#allocation8 + $0x2a8] ss:$16 sps:$4 sm:$0xff]  }
 0x426   :  { %v1071_v38 = vrot.slane %v1063_v32, 7  ;;  %v1095_v39 = vrot.slane %v1063_v32, 1  ;;  %v1065_v40 = vmax.f32 %v1057_v33, 0.0  ;;  %v3842_v33 = vld [vmem:[#allocation8 + $0x2c0] ss:$16 sps:$4 sm:$0xff]  }
 0x427   :  { %v1100_v10 = vsel %vm215_vm1, %v1092_v8, %v1094_v36  ;;  %v1072_v43 = vrot.slane %v1064_v37, 7  ;;  %v1096_v45 = vrot.slane %v1064_v37, 1  ;;  %v1076_v46 = vsel %vm194_vm0, %v1068_v7, %v1070_v35  ;;  %v3814_v8 = vld [vmem:[#allocation8 + $0x224] ss:$16 sps:$4 sm:$0xff]  }
 0x428   :  { %v4563_v48 = vpack.c.bf16 %v1100_v10, %v1102_v21  ;;  %v1073_v49 = vrot.slane %v1065_v40, 7  ;;  %v1097_v47 = vrot.slane %v1065_v40, 1  ;;  %v1077_v28 = vsel %vm194_vm0, %v1069_v13, %v1071_v38  ;;  %v3829_v21 = vld [vmem:[#allocation8 + $0x26c] ss:$16 sps:$4 sm:$0xff]  }
 0x429   :  { %v1080_v50 = vsel %vm194_vm0, %v1072_v43, %v1066_v0  ;;  %v1074_v51 = vsel %vm194_vm0, %v1070_v35, %v1072_v43  ;;  %v4571_v52 = vpack.c.bf16 %v1065_v40, %v1063_v32  ;;  %v4573_v53 = vpack.c.bf16 %v1064_v37, %v1062_v30  ;;  %v3836_v30 = vld [vmem:[#allocation8 + $0x2a0] ss:$16 sps:$4 sm:$0xff]   ;;  %v3844_v32 = vld [vmem:[#allocation8 + $0x2c4] ss:$16 sps:$4 sm:$0xff]   ;;  %v3845_v35 = vld [vmem:[#allocation8 + $0x2c8] ss:$16 sps:$4 sm:$0xff]  }
 0x42a   :  { %v3428_v54 = vpack.c.bf16 %v1078_v20, %v1080_v50  ;;  %v1081_v57 = vsel %vm194_vm0, %v1073_v49, %v1067_v18  ;;  %v1075_v58 = vsel %vm194_vm0, %v1071_v38, %v1073_v49  ;;  %v3434_v59 = vpack.c.bf16 %v1074_v51, %v1076_v46  ;;  %v3821_v20 = vld [vmem:[#allocation8 + $0x248] ss:$16 sps:$4 sm:$0xff]   ;;  %v3853_v37 = vld [vmem:[#allocation8 + $0x2ec] ss:$16 sps:$4 sm:$0xff]   ;;  %v3848_v38 = vld [vmem:[#allocation8 + $0x2e0] ss:$16 sps:$4 sm:$0xff]  }
 0x42b   :  { %v3425_v60 = vpack.c.bf16 %v1079_v27, %v1081_v57  ;;  %v3431_v63 = vpack.c.bf16 %v1075_v58, %v1077_v28  ;;  %v1101_v0 = vsel %vm215_vm1, %v1093_v14, %v1095_v39  ;;  %v1099_v2 = vsel %vm215_vm1, %v1095_v39, %v1097_v47  ;;  %v3820_v14 = vld [vmem:[#allocation8 + $0x244] ss:$16 sps:$4 sm:$0xff]   ;;  %v3833_v27 = vld [vmem:[#allocation8 + $0x288] ss:$16 sps:$4 sm:$0xff]   ;;  %v3859_v10 = vld [vmem:[#allocation8 + $0x30c] ss:$16 sps:$4 sm:$0xff]  }
 0x42c   :  { %v4583_v5 = vpack.c.bf16 %v1101_v0, %v1103_v29  ;;  %v1105_v6 = vsel %vm215_vm1, %v1097_v47, %v1091_v4  ;;  %v1098_v18 = vsel %vm215_vm1, %v1094_v36, %v1096_v45  ;;  %v1104_v7 = vsel %vm215_vm1, %v1096_v45, %v1090_v3  ;;  %v3812_v3 = vld [vmem:[#allocation8 + $0x220] ss:$16 sps:$4 sm:$0xff]   ;;  %v3815_v4 = vld [vmem:[#allocation8 + $0x228] ss:$16 sps:$4 sm:$0xff]   ;;  %v3841_v29 = vld [vmem:[#allocation8 + $0x2ac] ss:$16 sps:$4 sm:$0xff]  }
 0x42d   :  { %3426 = vmatprep.mubr.msk.bf16.mxu1 %vm4480_vm11, %v3425_v60  ;;  %3450 = vmatprep.mubr.msk.bf16.mxu0 %vm4480_vm11, %v3425_v60  ;;  %v4595_v12 = vpack.c.bf16 %v1105_v6, %v1099_v2  ;;  %v4597_v13 = vpack.c.bf16 %v1104_v7, %v1098_v18  ;;  %v3850_v36 = vld [vmem:[#allocation8 + $0x2e4] ss:$16 sps:$4 sm:$0xff]   ;;  %v3851_v39 = vld [vmem:[#allocation8 + $0x2e8] ss:$16 sps:$4 sm:$0xff]   ;;  %v3854_v43 = vld [vmem:[#allocation8 + $0x300] ss:$16 sps:$4 sm:$0xff]  }
 0x42e   :  { %3429 = vmatmul.mubr.msk.bf16.vlgmr.msra.gmra.mrb[8].mxu1 %vm4480_vm11, %v3428_v54  ;;  %3453 = vmatmul.mubr.msk.bf16.vlgmr.msra.gmra.mrb[12].mxu0 %vm4480_vm11, %v3428_v54  ;;  %v3856_v40 = vld [vmem:[#allocation8 + $0x304] ss:$16 sps:$4 sm:$0xff]   ;;  %v3857_v45 = vld [vmem:[#allocation8 + $0x308] ss:$16 sps:$4 sm:$0xff]   ;;  %v3865_v49 = vld [vmem:[#allocation8 + $0x32c] ss:$16 sps:$4 sm:$0xff]  }
 0x42f   :  { %2332 = vmatpush1.bf16.msra.mxu1 %v3806_v61  ;;  %2491 = vmatpush1.bf16.msra.mxu0 %v3809_v62  ;;  %v3862_v46 = vld [vmem:[#allocation8 + $0x324] ss:$16 sps:$4 sm:$0xff]   ;;  %v3860_v47 = vld [vmem:[#allocation8 + $0x320] ss:$16 sps:$4 sm:$0xff]   ;;  %v3863_v28 = vld [vmem:[#allocation8 + $0x328] ss:$16 sps:$4 sm:$0xff]  }
 0x430   :  { %3432 = vmatprep.mubr.msk.bf16.mxu1 %vm4495_vm12, %v3431_v63  ;;  %3456 = vmatprep.mubr.msk.bf16.mxu0 %vm4495_vm12, %v3431_v63  ;;  %v3868_v50 = vld [vmem:[#allocation8 + $0x344] ss:$16 sps:$4 sm:$0xff]   ;;  %v3871_v51 = vld [vmem:[#allocation8 + $0x34c] ss:$16 sps:$4 sm:$0xff]   ;;  %v3866_v54 = vld [vmem:[#allocation8 + $0x340] ss:$16 sps:$4 sm:$0xff]  }
 0x431   :  { %2333 = vmatprep.subr.bf16.mxu1 %v3814_v8  ;;  %2492 = vmatprep.subr.bf16.mxu0 %v3817_v11  ;;  %v3869_v57 = vld [vmem:[#allocation8 + $0x348] ss:$16 sps:$4 sm:$0xff]   ;;  %v3874_v58 = vld [vmem:[#allocation8 + $0x364] ss:$16 sps:$4 sm:$0xff]   ;;  %v3872_v60 = vld [vmem:[#allocation8 + $0x360] ss:$16 sps:$4 sm:$0xff]  }
 0x432   :  { %v3875_v61 = vld [vmem:[#allocation8 + $0x368] ss:$16 sps:$4 sm:$0xff]   ;;  %v3880_v62 = vld [vmem:[#allocation8 + $0x384] ss:$16 sps:$4 sm:$0xff]   ;;  %v3883_v63 = vld [vmem:[#allocation8 + $0x38c] ss:$16 sps:$4 sm:$0xff]  }
 0x433   :  { %2334 = vmatpush1.bf16.msra.mxu1 %v3812_v3  ;;  %2493 = vmatpush1.bf16.msra.mxu0 %v3815_v4  ;;  %v3878_v0 = vld [vmem:[#allocation8 + $0x380] ss:$16 sps:$4 sm:$0xff]   ;;  %v3881_v2 = vld [vmem:[#allocation8 + $0x388] ss:$16 sps:$4 sm:$0xff]   ;;  %v3886_v6 = vld [vmem:[#allocation8 + $0x3a4] ss:$16 sps:$4 sm:$0xff]  }
 0x434   :  { %2335 = vmatprep.subr.bf16.mxu1 %v3820_v14  ;;  %2494 = vmatprep.subr.bf16.mxu0 %v3823_v15  ;;  %v3889_v18 = vld [vmem:[#allocation8 + $0x3ac] ss:$16 sps:$4 sm:$0xff]   ;;  %v3884_v7 = vld [vmem:[#allocation8 + $0x3a0] ss:$16 sps:$4 sm:$0xff]   ;;  %v3887_v8 = vld [vmem:[#allocation8 + $0x3a8] ss:$16 sps:$4 sm:$0xff]  }
 0x435   :  { %v3892_v11 = vld [vmem:[#allocation8 + $0x3c4] ss:$16 sps:$4 sm:$0xff]   ;;  %v3895_v3 = vld [vmem:[#allocation8 + $0x3cc] ss:$16 sps:$4 sm:$0xff]   ;;  %v3890_v4 = vld [vmem:[#allocation8 + $0x3c0] ss:$16 sps:$4 sm:$0xff]  }
 0x436   :  { %3435 = vmatmul.mubr.msk.bf16.gmra.mrb[12].mxu1 %vm4495_vm12, %v3434_v59  ;;  %3459 = vmatmul.mubr.msk.bf16.gmra.mrb[16].mxu0 %vm4495_vm12, %v3434_v59  ;;  %v3877_v59 = vld [vmem:[#allocation8 + $0x36c] ss:$16 sps:$4 sm:$0xff]   ;;  %v3893_v14 = vld [vmem:[#allocation8 + $0x3c8] ss:$16 sps:$4 sm:$0xff]   ;;  %v3898_v15 = vld [vmem:[#allocation8 + $0x3e4] ss:$16 sps:$4 sm:$0xff]  }
 0x437   :  { %2336 = vmatpush1.bf16.msra.mxu1 %v3818_v17  ;;  %2495 = vmatpush1.bf16.msra.mxu0 %v3821_v20  ;;  %v3901_v17 = vld [vmem:[#allocation8 + $0x3ec] ss:$16 sps:$4 sm:$0xff]   ;;  %v3896_v20 = vld [vmem:[#allocation8 + $0x3e0] ss:$16 sps:$4 sm:$0xff]  }
 0x438   :  { %2363 = vmatprep.mubr.bf16.mxu1 %v4549_v19  ;;  %2522 = vmatprep.mubr.bf16.mxu0 %v4549_v19  ;;  %v3847_v19 = vld [vmem:[#allocation8 + $0x2cc] ss:$16 sps:$4 sm:$0xff]  }
 0x439   :  { %2337 = vmatprep.subr.bf16.mxu1 %v3826_v34  ;;  %2496 = vmatprep.subr.bf16.mxu0 %v3829_v21  ;;  %v3899_v34 = vld [vmem:[#allocation8 + $0x3e8] ss:$16 sps:$4 sm:$0xff]   ;;  %v3904_v21 = vld [vmem:[#allocation8 + $0x404] ss:$16 sps:$4 sm:$0xff]  }
 0x43b   :  { %2338 = vmatpush1.bf16.msra.mxu1 %v3824_v22  ;;  %2497 = vmatpush1.bf16.msra.mxu0 %v3827_v23  ;;  %v3907_v22 = vld [vmem:[#allocation8 + $0x40c] ss:$16 sps:$4 sm:$0xff]   ;;  %v3902_v23 = vld [vmem:[#allocation8 + $0x400] ss:$16 sps:$4 sm:$0xff]  }
 0x43c   :  { %2339 = vmatprep.subr.bf16.mxu1 %v3832_v24  ;;  %2498 = vmatprep.subr.bf16.mxu0 %v3835_v25  ;;  %v3905_v24 = vld [vmem:[#allocation8 + $0x408] ss:$16 sps:$4 sm:$0xff]   ;;  %v3910_v25 = vld [vmem:[#allocation8 + $0x424] ss:$16 sps:$4 sm:$0xff]  }
 0x43f   :  { %2340 = vmatpush1.bf16.msra.mxu1 %v3830_v26  ;;  %2499 = vmatpush1.bf16.msra.mxu0 %v3833_v27  ;;  %v3913_v26 = vld [vmem:[#allocation8 + $0x42c] ss:$16 sps:$4 sm:$0xff]   ;;  %v3908_v27 = vld [vmem:[#allocation8 + $0x420] ss:$16 sps:$4 sm:$0xff]  }
 0x440   :  { %2341 = vmatprep.subr.bf16.mxu1 %v3838_v44  ;;  %2500 = vmatprep.subr.bf16.mxu0 %v3841_v29  ;;  %v3911_v44 = vld [vmem:[#allocation8 + $0x428] ss:$16 sps:$4 sm:$0xff]   ;;  %v3916_v29 = vld [vmem:[#allocation8 + $0x444] ss:$16 sps:$4 sm:$0xff]  }
 0x443   :  { %2342 = vmatpush1.bf16.msra.mxu1 %v3836_v30  ;;  %2501 = vmatpush1.bf16.msra.mxu0 %v3839_v31  ;;  %v3919_v30 = vld [vmem:[#allocation8 + $0x44c] ss:$16 sps:$4 sm:$0xff]   ;;  %v3914_v31 = vld [vmem:[#allocation8 + $0x440] ss:$16 sps:$4 sm:$0xff]  }
 0x444   :  { %2343 = vmatprep.subr.bf16.mxu1 %v3844_v32  ;;  %2502 = vmatprep.subr.bf16.mxu0 %v3847_v19  ;;  %v3917_v32 = vld [vmem:[#allocation8 + $0x448] ss:$16 sps:$4 sm:$0xff]   ;;  %v3922_v19 = vld [vmem:[#allocation8 + $0x464] ss:$16 sps:$4 sm:$0xff]  }
 0x447   :  { %2344 = vmatpush1.bf16.msra.mxu1 %v3842_v33  ;;  %2503 = vmatpush1.bf16.msra.mxu0 %v3845_v35  ;;  %v3923_v33 = vld [vmem:[#allocation8 + $0x468] ss:$16 sps:$4 sm:$0xff]   ;;  %v3928_v35 = vld [vmem:[#allocation8 + $0x484] ss:$16 sps:$4 sm:$0xff]  }
 0x448   :  { %2345 = vmatprep.subr.bf16.mxu1 %v3850_v36  ;;  %2504 = vmatprep.subr.bf16.mxu0 %v3853_v37  ;;  %v3931_v36 = vld [vmem:[#allocation8 + $0x48c] ss:$16 sps:$4 sm:$0xff]   ;;  %v3926_v37 = vld [vmem:[#allocation8 + $0x480] ss:$16 sps:$4 sm:$0xff]  }
 0x44b   :  { %2346 = vmatpush1.bf16.msra.mxu1 %v3848_v38  ;;  %2505 = vmatpush1.bf16.msra.mxu0 %v3851_v39  ;;  %v3934_v38 = vld [vmem:[#allocation8 + $0x4a4] ss:$16 sps:$4 sm:$0xff]   ;;  %v3937_v39 = vld [vmem:[#allocation8 + $0x4ac] ss:$16 sps:$4 sm:$0xff]  }
 0x44c   :  { %2347 = vmatprep.subr.bf16.mxu1 %v3856_v40  ;;  %2506 = vmatprep.subr.bf16.mxu0 %v3859_v10  ;;  %v3932_v40 = vld [vmem:[#allocation8 + $0x4a0] ss:$16 sps:$4 sm:$0xff]   ;;  %v3935_v10 = vld [vmem:[#allocation8 + $0x4a8] ss:$16 sps:$4 sm:$0xff]  }
 0x44f   :  { %2348 = vmatpush1.bf16.msra.mxu1 %v3854_v43  ;;  %2507 = vmatpush1.bf16.msra.mxu0 %v3857_v45  ;;  %v3940_v43 = vld [vmem:[#allocation8 + $0x4c4] ss:$16 sps:$4 sm:$0xff]   ;;  %v3938_v45 = vld [vmem:[#allocation8 + $0x4c0] ss:$16 sps:$4 sm:$0xff]  }
 0x450   :  { %2349 = vmatprep.subr.bf16.mxu1 %v3862_v46  ;;  %2508 = vmatprep.subr.bf16.mxu0 %v3865_v49  ;;  %v3941_v46 = vld [vmem:[#allocation8 + $0x4c8] ss:$16 sps:$4 sm:$0xff]   ;;  %v3946_v49 = vld [vmem:[#allocation8 + $0x4e4] ss:$16 sps:$4 sm:$0xff]  }
 0x453   :  { %2350 = vmatpush1.bf16.msra.mxu1 %v3860_v47  ;;  %2509 = vmatpush1.bf16.msra.mxu0 %v3863_v28  ;;  %v3949_v47 = vld [vmem:[#allocation8 + $0x4ec] ss:$16 sps:$4 sm:$0xff]   ;;  %v3944_v28 = vld [vmem:[#allocation8 + $0x4e0] ss:$16 sps:$4 sm:$0xff]  }
 0x454   :  { %2351 = vmatprep.subr.bf16.mxu1 %v3868_v50  ;;  %2510 = vmatprep.subr.bf16.mxu0 %v3871_v51  ;;  %v3947_v50 = vld [vmem:[#allocation8 + $0x4e8] ss:$16 sps:$4 sm:$0xff]   ;;  %v3952_v51 = vld [vmem:[#allocation8 + $0x504] ss:$16 sps:$4 sm:$0xff]  }
 0x457   :  { %2352 = vmatpush1.bf16.msra.mxu1 %v3866_v54  ;;  %2511 = vmatpush1.bf16.msra.mxu0 %v3869_v57  ;;  %v3955_v54 = vld [vmem:[#allocation8 + $0x50c] ss:$16 sps:$4 sm:$0xff]   ;;  %v3950_v57 = vld [vmem:[#allocation8 + $0x500] ss:$16 sps:$4 sm:$0xff]  }
 0x458   :  { %2353 = vmatprep.subr.bf16.mxu1 %v3874_v58  ;;  %2512 = vmatprep.subr.bf16.mxu0 %v3877_v59  ;;  %v3953_v58 = vld [vmem:[#allocation8 + $0x508] ss:$16 sps:$4 sm:$0xff]   ;;  %v3958_v59 = vld [vmem:[#allocation8 + $0x524] ss:$16 sps:$4 sm:$0xff]  }
 0x45b   :  { %2354 = vmatpush1.bf16.msra.mxu1 %v3872_v60  ;;  %2513 = vmatpush1.bf16.msra.mxu0 %v3875_v61  ;;  %v3961_v60 = vld [vmem:[#allocation8 + $0x52c] ss:$16 sps:$4 sm:$0xff]   ;;  %v3956_v61 = vld [vmem:[#allocation8 + $0x520] ss:$16 sps:$4 sm:$0xff]  }
 0x45c   :  { %2355 = vmatprep.subr.bf16.mxu1 %v3880_v62  ;;  %2514 = vmatprep.subr.bf16.mxu0 %v3883_v63  ;;  %v3959_v62 = vld [vmem:[#allocation8 + $0x528] ss:$16 sps:$4 sm:$0xff]   ;;  %v3964_v63 = vld [vmem:[#allocation8 + $0x544] ss:$16 sps:$4 sm:$0xff]  }
 0x45f   :  { %2356 = vmatpush1.bf16.msra.mxu1 %v3878_v0  ;;  %2515 = vmatpush1.bf16.msra.mxu0 %v3881_v2  ;;  %v3967_v0 = vld [vmem:[#allocation8 + $0x54c] ss:$16 sps:$4 sm:$0xff]   ;;  %v3962_v2 = vld [vmem:[#allocation8 + $0x540] ss:$16 sps:$4 sm:$0xff]  }
 0x460   :  { %2357 = vmatprep.subr.bf16.mxu1 %v3886_v6  ;;  %2516 = vmatprep.subr.bf16.mxu0 %v3889_v18  ;;  %v3965_v6 = vld [vmem:[#allocation8 + $0x548] ss:$16 sps:$4 sm:$0xff]   ;;  %v3970_v18 = vld [vmem:[#allocation8 + $0x564] ss:$16 sps:$4 sm:$0xff]  }
 0x463   :  { %2358 = vmatpush1.bf16.msra.mxu1 %v3884_v7  ;;  %2517 = vmatpush1.bf16.msra.mxu0 %v3887_v8  ;;  %v3973_v7 = vld [vmem:[#allocation8 + $0x56c] ss:$16 sps:$4 sm:$0xff]   ;;  %v3968_v8 = vld [vmem:[#allocation8 + $0x560] ss:$16 sps:$4 sm:$0xff]  }
 0x464   :  { %2359 = vmatprep.subr.bf16.mxu1 %v3892_v11  ;;  %2518 = vmatprep.subr.bf16.mxu0 %v3895_v3  ;;  %v3971_v11 = vld [vmem:[#allocation8 + $0x568] ss:$16 sps:$4 sm:$0xff]   ;;  %v3976_v3 = vld [vmem:[#allocation8 + $0x584] ss:$16 sps:$4 sm:$0xff]  }
 0x467   :  { %2360 = vmatpush1.bf16.msra.mxu1 %v3890_v4  ;;  %2519 = vmatpush1.bf16.msra.mxu0 %v3893_v14  ;;  %v3979_v4 = vld [vmem:[#allocation8 + $0x58c] ss:$16 sps:$4 sm:$0xff]   ;;  %v3974_v14 = vld [vmem:[#allocation8 + $0x580] ss:$16 sps:$4 sm:$0xff]  }
 0x468   :  { %2361 = vmatprep.subr.bf16.mxu1 %v3898_v15  ;;  %2520 = vmatprep.subr.bf16.mxu0 %v3901_v17  ;;  %v3977_v15 = vld [vmem:[#allocation8 + $0x588] ss:$16 sps:$4 sm:$0xff]   ;;  %v3982_v17 = vld [vmem:[#allocation8 + $0x5a4] ss:$16 sps:$4 sm:$0xff]  }
 0x46b   :  { %2362 = vmatpush1.bf16.msra.mxu1 %v3896_v20  ;;  %2521 = vmatpush1.bf16.msra.mxu0 %v3899_v34  ;;  %v3985_v20 = vld [vmem:[#allocation8 + $0x5ac] ss:$16 sps:$4 sm:$0xff]   ;;  %v3980_v34 = vld [vmem:[#allocation8 + $0x5a0] ss:$16 sps:$4 sm:$0xff]  }
 0x46c   :  { %2384 = vmatprep.subr.bf16.mxu1 %v3904_v21  ;;  %2543 = vmatprep.subr.bf16.mxu0 %v3907_v22  ;;  %v3983_v21 = vld [vmem:[#allocation8 + $0x5a8] ss:$16 sps:$4 sm:$0xff]   ;;  %v3988_v22 = vld [vmem:[#allocation8 + $0x5c4] ss:$16 sps:$4 sm:$0xff]  }
 0x46e   :  { %2364 = vmatmul.mubr.bf16.vlgmr.msra.gmra.mrb[8].mxu1 %v4546_v9  ;;  %2523 = vmatmul.mubr.bf16.vlgmr.msra.gmra.mrb[12].mxu0 %v4546_v9  ;;  %v3925_v9 = vld [vmem:[#allocation8 + $0x46c] ss:$16 sps:$4 sm:$0xff]  }
 0x46f   :  { %2373 = vmatprep.mubr.bf16.mxu1 %v4571_v52  ;;  %2385 = vmatpush1.bf16.msra.mxu1 %v3902_v23  ;;  %v3991_v23 = vld [vmem:[#allocation8 + $0x5cc] ss:$16 sps:$4 sm:$0xff]  }
 0x470   :  { %2532 = vmatprep.mubr.bf16.mxu0 %v4571_v52  ;;  %2544 = vmatpush1.bf16.msra.mxu0 %v3905_v24  ;;  %v3920_v52 = vld [vmem:[#allocation8 + $0x460] ss:$16 sps:$4 sm:$0xff]  }
 0x471   :  { %2386 = vmatprep.subr.bf16.mxu1 %v3910_v25  ;;  %2545 = vmatprep.subr.bf16.mxu0 %v3913_v26  ;;  %v3986_v24 = vld [vmem:[#allocation8 + $0x5c0] ss:$16 sps:$4 sm:$0xff]   ;;  %v3989_v25 = vld [vmem:[#allocation8 + $0x5c8] ss:$16 sps:$4 sm:$0xff]   ;;  %v3994_v26 = vld [vmem:[#allocation8 + $0x5e4] ss:$16 sps:$4 sm:$0xff]  }
 0x473   :  { %2387 = vmatpush1.bf16.msra.mxu1 %v3908_v27  ;;  %v3997_v27 = vld [vmem:[#allocation8 + $0x5ec] ss:$16 sps:$4 sm:$0xff]  }
 0x474   :  { %2546 = vmatpush1.bf16.msra.mxu0 %v3911_v44  ;;  %2388 = vmatprep.subr.bf16.mxu1 %v3916_v29  ;;  %v3992_v44 = vld [vmem:[#allocation8 + $0x5e0] ss:$16 sps:$4 sm:$0xff]   ;;  %v3995_v29 = vld [vmem:[#allocation8 + $0x5e8] ss:$16 sps:$4 sm:$0xff]  }
 0x475   :  { %2547 = vmatprep.subr.bf16.mxu0 %v3919_v30  ;;  %v2634_v30 = vld [vmem:[%s4690_s13] sm:$0xf] }
 0x476   :  { %2374 = vmatmul.mubr.bf16.gmra.mrb[12].mxu1 %v4573_v53  ;;  %2533 = vmatmul.mubr.bf16.gmra.mrb[16].mxu0 %v4573_v53  ;;  %v3929_v53 = vld [vmem:[#allocation8 + $0x488] ss:$16 sps:$4 sm:$0xff]  }
 0x477   :  { %2389 = vmatpush1.bf16.msra.mxu1 %v3914_v31  ;;  %3438 = vmatprep.mubr.msk.bf16.mxu1 %vm4505_vm13, %v4583_v5  ;;  %v2601_v31 = vrot.slane %v2596_v56, %v4522_v41 }
 0x478   :  { %2548 = vmatpush1.bf16.msra.mxu0 %v3917_v32  ;;  %3462 = vmatprep.mubr.msk.bf16.mxu0 %vm4505_vm13, %v4583_v5  ;;  %v3943_v5 = vld [vmem:[#allocation8 + $0x4cc] ss:$16 sps:$4 sm:$0xff]   ;;  %v2639_v32 = vrot.slane %v2634_v30, %v4522_v41 }
 0x479   :  { %2390 = vmatprep.subr.bf16.mxu1 %v3922_v19  ;;  %2549 = vmatprep.subr.bf16.mxu0 %v3925_v9 }
 0x47b   :  { %2391 = vmatpush1.bf16.msra.mxu1 %v3920_v52  ;;  %v2643_v52 = vrot.slane %v2634_v30, %v4528_v42 }
 0x47c   :  { %2550 = vmatpush1.bf16.msra.mxu0 %v3923_v33  ;;  %2392 = vmatprep.subr.bf16.mxu1 %v3928_v35 }
 0x47d   :  { %2551 = vmatprep.subr.bf16.mxu0 %v3931_v36 }
 0x47f   :  { %2393 = vmatpush1.bf16.msra.mxu1 %v3926_v37 }
 0x480   :  { %2552 = vmatpush1.bf16.msra.mxu0 %v3929_v53  ;;  %2394 = vmatprep.subr.bf16.mxu1 %v3934_v38 }
 0x481   :  { %2553 = vmatprep.subr.bf16.mxu0 %v3937_v39 }
 0x483   :  { %2395 = vmatpush1.bf16.msra.mxu1 %v3932_v40 }
 0x484   :  { %2554 = vmatpush1.bf16.msra.mxu0 %v3935_v10  ;;  %2396 = vmatprep.subr.bf16.mxu1 %v3940_v43 }
 0x485   :  { %2555 = vmatprep.subr.bf16.mxu0 %v3943_v5 }
 0x487   :  { %2397 = vmatpush1.bf16.msra.mxu1 %v3938_v45 }
 0x488   :  { %2556 = vmatpush1.bf16.msra.mxu0 %v3941_v46  ;;  %2398 = vmatprep.subr.bf16.mxu1 %v3946_v49 }
 0x489   :  { %2557 = vmatprep.subr.bf16.mxu0 %v3949_v47 }
 0x48b   :  { %2399 = vmatpush1.bf16.msra.mxu1 %v3944_v28 }
 0x48c   :  { %2558 = vmatpush1.bf16.msra.mxu0 %v3947_v50  ;;  %2400 = vmatprep.subr.bf16.mxu1 %v3952_v51 }
 0x48d   :  { %2559 = vmatprep.subr.bf16.mxu0 %v3955_v54 }
 0x48f   :  { %2401 = vmatpush1.bf16.msra.mxu1 %v3950_v57 }
 0x490   :  { %2560 = vmatpush1.bf16.msra.mxu0 %v3953_v58  ;;  %2402 = vmatprep.subr.bf16.mxu1 %v3958_v59 }
 0x491   :  { %2561 = vmatprep.subr.bf16.mxu0 %v3961_v60 }
 0x493   :  { %2403 = vmatpush1.bf16.msra.mxu1 %v3956_v61 }
 0x494   :  { %2562 = vmatpush1.bf16.msra.mxu0 %v3959_v62  ;;  %2404 = vmatprep.subr.bf16.mxu1 %v3964_v63 }
 0x495   :  { %2563 = vmatprep.subr.bf16.mxu0 %v3967_v0 }
 0x497   :  { %2405 = vmatpush1.bf16.msra.mxu1 %v3962_v2 }
 0x498   :  { %2564 = vmatpush1.bf16.msra.mxu0 %v3965_v6  ;;  %2406 = vmatprep.subr.bf16.mxu1 %v3970_v18 }
 0x499   :  { %2565 = vmatprep.subr.bf16.mxu0 %v3973_v7 }
 0x49b   :  { %2407 = vmatpush1.bf16.msra.mxu1 %v3968_v8 }
 0x49c   :  { %2566 = vmatpush1.bf16.msra.mxu0 %v3971_v11  ;;  %2408 = vmatprep.subr.bf16.mxu1 %v3976_v3 }
 0x49d   :  { %2567 = vmatprep.subr.bf16.mxu0 %v3979_v4 }
 0x49f   :  { %2409 = vmatpush1.bf16.msra.mxu1 %v3974_v14 }
 0x4a0   :  { %2568 = vmatpush1.bf16.msra.mxu0 %v3977_v15  ;;  %2410 = vmatprep.subr.bf16.mxu1 %v3982_v17 }
 0x4a1   :  { %2569 = vmatprep.subr.bf16.mxu0 %v3985_v20 }
 0x4a3   :  { %2411 = vmatpush1.bf16.msra.mxu1 %v3980_v34 }
 0x4a4   :  { %2570 = vmatpush1.bf16.msra.mxu0 %v3983_v21  ;;  %2412 = vmatprep.subr.bf16.mxu1 %v3988_v22 }
 0x4a5   :  { %2571 = vmatprep.subr.bf16.mxu0 %v3991_v23 }
 0x4a7   :  { %2413 = vmatpush1.bf16.msra.mxu1 %v3986_v24 }
 0x4a8   :  { %2572 = vmatpush1.bf16.msra.mxu0 %v3989_v25  ;;  %2414 = vmatprep.subr.bf16.mxu1 %v3994_v26 }
 0x4a9   :  { %2573 = vmatprep.subr.bf16.mxu0 %v3997_v27 }
 0x4ab   :  { %2415 = vmatpush1.bf16.msra.mxu1 %v3992_v44 }
 0x4ac   :  { %2574 = vmatpush1.bf16.msra.mxu0 %v3995_v29 }
 0x4ae   :  { %3441 = vmatmul.mubr.msk.bf16.vlgmr.msra.gmra.mrb[8].mxu1 %vm4505_vm13, %v4563_v48 }
 0x4af   :  { %3465 = vmatmul.mubr.msk.bf16.vlgmr.msra.gmra.mrb[12].mxu0 %vm4505_vm13, %v4563_v48  ;;  %3444 = vmatprep.mubr.msk.bf16.mxu1 %vm4515_vm14, %v4595_v12  ;;  %v2608_v48 = vsub.s32 2, %v4346_v1 }
 0x4b0   :  { %3468 = vmatprep.mubr.msk.bf16.mxu0 %vm4515_vm14, %v4595_v12  ;;  %v2612_v12 = vsub.s32 3, %v4346_v1 }
 0x4b1   :  { %v2609_v16 = vrot.slane %v2596_v56, %v2608_v48  ;;  %v2647_v9 = vrot.slane %v2634_v30, %v2608_v48 }
 0x4b2   :  { %v2651_v1 = vrot.slane %v2634_v30, %v2612_v12 }
 0x4b6   :  { %3447 = vmatmul.mubr.msk.bf16.gmra.mrb[12].mxu1 %vm4515_vm14, %v4597_v13 }
 0x4b7   :  { %3471 = vmatmul.mubr.msk.bf16.gmra.mrb[16].mxu0 %vm4515_vm14, %v4597_v13  ;;  %2773 = vmatprep.mubr.bf16.mxu1 %v4184_v55  ;;  %v2605_v13 = vrot.slane %v2596_v56, %v4528_v42 }
 0x4b8   :  { %2732 = vmatprep.mubr.bf16.mxu0 %v4184_v55  ;;  %v2613_v55 = vrot.slane %v2596_v56, %v2612_v12 }
 0x581   :  { %v2418_v19 = vpop.f32.mrb[8].mxu1 }
 0x582   :  { %v2618_v33 = vmul.f32 %v2601_v31, %v2418_v19  ;;  %v2577_v35 = vpop.f32.mrb[12].mxu0  ;;  %v2420_v36 = vpop.f32.mrb[9].mxu1 }
 0x583   :  { %v2620_v37 = vmul.f32 %v2609_v16, %v2577_v35  ;;  %v2619_v53 = vmul.f32 %v2605_v13, %v2420_v36  ;;  %v2579_v38 = vpop.f32.mrb[13].mxu0  ;;  %v2422_v39 = vpop.f32.mrb[10].mxu1 }
 0x584   :  { %v2656_v40 = vadd.f32 %v2639_v32, %v2618_v33  ;;  %v2621_v10 = vmul.f32 %v2613_v55, %v2579_v38  ;;  %v2622_v43 = vmul.f32 %v2601_v31, %v2422_v39  ;;  %v2581_v5 = vpop.f32.mrb[14].mxu0  ;;  %v2424_v45 = vpop.f32.mrb[11].mxu1 }
 0x585   :  { %v2658_v46 = vadd.f32 %v2647_v9, %v2620_v37  ;;  %v2657_v41 = vadd.f32 %v2643_v52, %v2619_v53  ;;  %v2624_v49 = vmul.f32 %v2609_v16, %v2581_v5  ;;  %v2623_v47 = vmul.f32 %v2605_v13, %v2424_v45  ;;  %v2583_v28 = vpop.f32.mrb[15].mxu0 }
 0x586   :  { %v2659_v50 = vadd.f32 %v2651_v1, %v2621_v10  ;;  %v2660_v42 = vadd.f32 %v2639_v32, %v2622_v43  ;;  %v2625_v51 = vmul.f32 %v2613_v55, %v2583_v28  ;;  %v2672_v58 = vmax.f32 %v2656_v40, 0.0  ;;  %v4006_v28 = vld [vmem:[#allocation10 + $0x60] sm:$0xff]  }
 0x587   :  { %v2662_v54 = vadd.f32 %v2647_v9, %v2624_v49  ;;  %v2661_v57 = vadd.f32 %v2643_v52, %v2623_v47  ;;  %v2674_v61 = vmax.f32 %v2658_v46, 0.0  ;;  %v2673_v62 = vmax.f32 %v2657_v41, 0.0  ;;  %v4002_v46 = vld [vmem:[#allocation10 + $0x50] sm:$0xff]   ;;  %v4004_v49 = vld [vmem:[#allocation10 + $0x58] sm:$0xff]  }
 0x588   :  { %v2676_v59 = vmax.f32 %v2660_v42, 0.0  ;;  %v2663_v60 = vadd.f32 %v2651_v1, %v2625_v51  ;;  %v2675_v6 = vmax.f32 %v2659_v50, 0.0  ;;  %v4003_v41 = vld [vmem:[#allocation10 + $0x10] sm:$0xff]   ;;  %v4005_v47 = vld [vmem:[#allocation10 + $0x18] sm:$0xff]   ;;  %v4007_v50 = vld [vmem:[#allocation10 + $0x20] sm:$0xff]  }
 0x589   :  { %v2678_v63 = vmax.f32 %v2662_v54, 0.0  ;;  %v2677_v0 = vmax.f32 %v2661_v57, 0.0  ;;  %v2428_v2 = vpop.f32.mrb[12].mxu1  ;;  %v4008_v42 = vld [vmem:[#allocation10 + $0x68] sm:$0xff]   ;;  %v4010_v54 = vld [vmem:[#allocation10 + $0x70] sm:$0xff]  }
 0x58a   :  { %v2689_v18 = vpack.c.bf16 %v2676_v59, %v2672_v58  ;;  %v2679_v7 = vmax.f32 %v2663_v60, 0.0  ;;  %v2626_v8 = vmul.f32 %v2601_v31, %v2428_v2  ;;  %v2587_v11 = vpop.f32.mrb[16].mxu0  ;;  %v2430_v3 = vpop.f32.mrb[13].mxu1  ;;  %v4009_v51 = vld [vmem:[#allocation10 + $0x28] sm:$0xff]   ;;  %v4011_v57 = vld [vmem:[#allocation10 + $0x30] sm:$0xff]   ;;  %v4012_v58 = vld [vmem:[#allocation10 + $0x78] sm:$0xff]  }
 0x58b   :  { %v2691_v4 = vpack.c.bf16 %v2678_v63, %v2674_v61  ;;  %v2628_v14 = vmul.f32 %v2609_v16, %v2587_v11  ;;  %v2627_v15 = vmul.f32 %v2605_v13, %v2430_v3  ;;  %v2589_v17 = vpop.f32.mrb[17].mxu0  ;;  %v2432_v20 = vpop.f32.mrb[14].mxu1  ;;  %v2690_v34 = vpack.c.bf16 %v2677_v0, %v2673_v62  ;;  %v4013_v59 = vld [vmem:[#allocation10 + $0x38] sm:$0xff]   ;;  %v4014_v60 = vld [vmem:[#allocation10 + $0xc0] sm:$0xff]   ;;  %v4016_v11 = vld [vmem:[#allocation10 + $0xc8] sm:$0xff]  }
 0x58c   :  { %v2664_v21 = vadd.f32 %v2639_v32, %v2626_v8  ;;  %v2629_v22 = vmul.f32 %v2613_v55, %v2589_v17  ;;  %v2630_v23 = vmul.f32 %v2601_v31, %v2432_v20  ;;  %v2591_v24 = vpop.f32.mrb[18].mxu0  ;;  %v2434_v25 = vpop.f32.mrb[15].mxu1  ;;  %v2692_v26 = vpack.c.bf16 %v2679_v7, %v2675_v6  ;;  %v4015_v6 = vld [vmem:[#allocation10 + $0x80] sm:$0xff]   ;;  %v4018_v17 = vld [vmem:[#allocation10 + $0xd0] sm:$0xff]  }
 0x58d   :  { %v2666_v27 = vadd.f32 %v2647_v9, %v2628_v14  ;;  %v2665_v44 = vadd.f32 %v2643_v52, %v2627_v15  ;;  %v2632_v29 = vmul.f32 %v2609_v16, %v2591_v24  ;;  %v2631_v56 = vmul.f32 %v2605_v13, %v2434_v25  ;;  %v2593_v48 = vpop.f32.mrb[19].mxu0  ;;  %2700 = vmatprep.subr.bf16.mxu0 %v2690_v34  ;;  %v4017_v15 = vld [vmem:[#allocation10 + $0x88] sm:$0xff]   ;;  %v4019_v20 = vld [vmem:[#allocation10 + $0x90] sm:$0xff]   ;;  %v4020_v34 = vld [vmem:[#allocation10 + $0xd8] sm:$0xff]  }
 0x58e   :  { %v2667_v12 = vadd.f32 %v2651_v1, %v2629_v22  ;;  %v2668_v30 = vadd.f32 %v2639_v32, %v2630_v23  ;;  %v2633_v19 = vmul.f32 %v2613_v55, %v2593_v48  ;;  %2741 = vmatprep.subr.bf16.mxu1 %v2692_v26  ;;  %2701 = vmatpush1.bf16.msra.mxu0 %v2689_v18  ;;  %v2680_v36 = vmax.f32 %v2664_v21, 0.0  ;;  %v3998_v32 = vld [vmem:[#allocation10 + $0x40] sm:$0xff]   ;;  %v4021_v21 = vld [vmem:[#allocation10 + $0x98] sm:$0xff]   ;;  %v4024_v24 = vld [vmem:[#allocation10 + $0xe8] sm:$0xff]  }
 0x58f   :  { %v2670_v33 = vadd.f32 %v2647_v9, %v2632_v29  ;;  %v2669_v35 = vadd.f32 %v2643_v52, %v2631_v56  ;;  %2742 = vmatpush1.bf16.msra.mxu1 %v2691_v4  ;;  %v2682_v53 = vmax.f32 %v2666_v27, 0.0  ;;  %v2681_v38 = vmax.f32 %v2665_v44, 0.0  ;;  %v2688_v55 = vld [vmem:[%s4678_s1] sm:$0x1]  ;;  %v4000_v52 = vld [vmem:[#allocation10 + $0x48] sm:$0xff]   ;;  %v4026_v26 = vld [vmem:[#allocation10 + $0xf0] sm:$0xff]  }
 0x590   :  { %v2684_v37 = vmax.f32 %v2668_v30, 0.0  ;;  %v2671_v31 = vadd.f32 %v2651_v1, %v2633_v19  ;;  %v2683_v10 = vmax.f32 %v2667_v12, 0.0  ;;  %v3999_v9 = vld [vmem:[#allocation10] sm:$0xff]   ;;  %v4001_v1 = vld [vmem:[#allocation10 + $0x8] sm:$0xff]   ;;  %v4027_v27 = vld [vmem:[#allocation10 + $0xb0] sm:$0xff]  }
 0x591   :  { %v2686_v39 = vmax.f32 %v2670_v33, 0.0  ;;  %v2685_v40 = vmax.f32 %v2669_v35, 0.0  ;;  %v4022_v22 = vld [vmem:[#allocation10 + $0xe0] sm:$0xff]   ;;  %v4025_v25 = vld [vmem:[#allocation10 + $0xa8] sm:$0xff]   ;;  %v4028_v44 = vld [vmem:[#allocation10 + $0xf8] sm:$0xff]  }
 0x592   :  { %v2693_v16 = vpack.c.bf16 %v2684_v37, %v2680_v36  ;;  %v2687_v13 = vmax.f32 %v2671_v31, 0.0  ;;  %v4023_v23 = vld [vmem:[#allocation10 + $0xa0] sm:$0xff]   ;;  %v4029_v29 = vld [vmem:[#allocation10 + $0xb8] sm:$0xff]  }
 0x593   :  { %v2695_v43 = vpack.c.bf16 %v2686_v39, %v2682_v53  ;;  %v2694_v5 = vpack.c.bf16 %v2685_v40, %v2681_v38  ;;  %v3474_v35 = vld [vmem:[%s4692_s15] ss:$0 sm:$0xff] }
 0x594   :  { %v2696_v45 = vpack.c.bf16 %v2687_v13, %v2683_v10 }
 0x595   :  { %2702 = vmatprep.subr.bf16.mxu0 %v2694_v5 }
 0x596   :  { %2743 = vmatprep.subr.bf16.mxu1 %v2696_v45  ;;  %2703 = vmatpush1.bf16.msra.mxu0 %v2693_v16 }
 0x597   :  { %2744 = vmatpush1.bf16.msra.mxu1 %v2695_v43 }
 0x598   :  { %3512 = vmatprep.subr.bf16.mxu1 %v3998_v32 }
 0x599   :  { %3472 = vmatmul.mubr.msk.bf16.vlgmr.msra.gmra.mrb[20].mxu0 %vm263_vm7, %v2688_v55 }
 0x59a   :  { %3473 = vmatmul.mubr.msk.bf16.vlgmr.msra.gmra.mrb[16].mxu1 %vm263_vm7, %v2688_v55 }
 0x59b   :  { %3513 = vmatpush3.bf16.msra.mxu1 %v3999_v9 }
 0x59c   :  { %3514 = vmatprep.subr.bf16.mxu1 %v4000_v52 }
 0x59f   :  { %3515 = vmatpush3.bf16.msra.mxu1 %v4001_v1 }
 0x5a0   :  { %3516 = vmatprep.subr.bf16.mxu1 %v4002_v46 }
 0x5a3   :  { %3517 = vmatpush3.bf16.msra.mxu1 %v4003_v41 }
 0x5a4   :  { %3518 = vmatprep.subr.bf16.mxu1 %v4004_v49 }
 0x5a7   :  { %3519 = vmatpush3.bf16.msra.mxu1 %v4005_v47 }
 0x5a8   :  { %3520 = vmatprep.subr.bf16.mxu1 %v4006_v28 }
 0x5ab   :  { %3521 = vmatpush3.bf16.msra.mxu1 %v4007_v50 }
 0x5ac   :  { %3522 = vmatprep.subr.bf16.mxu1 %v4008_v42 }
 0x5af   :  { %3523 = vmatpush3.bf16.msra.mxu1 %v4009_v51 }
 0x5b0   :  { %3524 = vmatprep.subr.bf16.mxu1 %v4010_v54 }
 0x5b3   :  { %3525 = vmatpush3.bf16.msra.mxu1 %v4011_v57 }
 0x5b4   :  { %3526 = vmatprep.subr.bf16.mxu1 %v4012_v58 }
 0x5b7   :  { %3527 = vmatpush3.bf16.msra.mxu1 %v4013_v59 }
 0x5b8   :  { %3534 = vmatprep.subr.bf16.mxu1 %v4014_v60 }
 0x66c   :  { %v2734_v61 = vpop.f32.mrb[20].mxu0 }
 0x66d   :  { %v2736_v62 = vpop.f32.mrb[21].mxu0  ;;  %v2775_v63 = vpop.f32.mrb[16].mxu1  ;;  %v2782_v7 = vpack.c.bf16 %v2734_v61, %v2734_v61 }
 0x66e   :  { %v2783_v0 = vpack.c.bf16 %v2736_v62, %v2736_v62  ;;  %v2738_v2 = vpop.f32.mrb[22].mxu0  ;;  %v2777_v18 = vpop.f32.mrb[17].mxu1  ;;  %v2784_v56 = vpack.c.bf16 %v2775_v63, %v2775_v63 }
 0x66f   :  { %v2739_v8 = vpop.f32.mrb[23].mxu0  ;;  %v2785_v3 = vpack.c.bf16 %v2777_v18, %v2777_v18  ;;  %v2779_v4 = vpop.f32.mrb[18].mxu1 }
 0x670   :  { %3081 = vmatprep.mubr.bf16.mxu1 %v2783_v0  ;;  %v2780_v14 = vpop.f32.mrb[19].mxu1 }
 0x671   :  { %3082 = vmatmul.mubr.bf16.vlgmr.msra.gmra.mrb[20].mxu1 %v2782_v7 }
 0x672   :  { %3535 = vmatpush3.bf16.msra.mxu1 %v4015_v6  ;;  %3121 = vmatprep.mubr.bf16.mxu1 %v2785_v3 }
 0x673   :  { %3536 = vmatprep.subr.bf16.mxu1 %v4016_v11 }
 0x676   :  { %3537 = vmatpush3.bf16.msra.mxu1 %v4017_v15 }
 0x677   :  { %3538 = vmatprep.subr.bf16.mxu1 %v4018_v17 }
 0x67a   :  { %3539 = vmatpush3.bf16.msra.mxu1 %v4019_v20 }
 0x67b   :  { %3540 = vmatprep.subr.bf16.mxu1 %v4020_v34 }
 0x67e   :  { %3541 = vmatpush3.bf16.msra.mxu1 %v4021_v21 }
 0x67f   :  { %3542 = vmatprep.subr.bf16.mxu1 %v4022_v22 }
 0x682   :  { %3543 = vmatpush3.bf16.msra.mxu1 %v4023_v23 }
 0x683   :  { %3544 = vmatprep.subr.bf16.mxu1 %v4024_v24 }
 0x686   :  { %3545 = vmatpush3.bf16.msra.mxu1 %v4025_v25 }
 0x687   :  { %3546 = vmatprep.subr.bf16.mxu1 %v4026_v26 }
 0x68a   :  { %3547 = vmatpush3.bf16.msra.mxu1 %v4027_v27 }
 0x68b   :  { %3548 = vmatprep.subr.bf16.mxu1 %v4028_v44 }
 0x68e   :  { %3549 = vmatpush3.bf16.msra.mxu1 %v4029_v29 }
 0x691   :  { %3122 = vmatmul.mubr.bf16.vlgmr.msra.gmra.mrb[24].mxu1 %v2784_v56 }
 0x744   :  { %v3528_v48 = vpop.f32.mrb[20].mxu1 }
 0x745   :  { %v3529_v12 = vpop.f32.mrb[21].mxu1 }
 0x746   :  { %v3530_v30 = vadd.f32 %v3529_v12, %v3528_v48  ;;  %v3531_v19 = vpop.f32.mrb[22].mxu1 }
 0x747   :  { %v3532_v33 = vpop.f32.mrb[23].mxu1 }
 0x748   :  { %v3084_v31 = vadd.f32 %v3530_v30, %v3474_v35 }
 0x764   :  { %v3550_v36 = vpop.f32.mrb[24].mxu1 }
 0x765   :  { %v3551_v37 = vpop.f32.mrb[25].mxu1 }
 0x766   :  { %v3552_v53 = vadd.f32 %v3551_v37, %v3550_v36  ;;  %v3553_v38 = vpop.f32.mrb[26].mxu1 }
 0x767   :  { %v3554_v39 = vpop.f32.mrb[27].mxu1 }
 0x768   :  { %v3124_v40 = vadd.f32 %v3552_v53, %v3084_v31 }
 0x76a   :  { %3129 = vst [vmem:[#allocation11] sm:$0x3] %v3124_v40 }
 0x76b   :  { %4153 = shalt.err (!%p4150_p2)
}
 0x76c   :  { %s4154_s11 = scalar_lea.hbm %s4693_s16, 32 }
 0x76d   :  { %p4155_p3 = scmp.ne.s32.totalorder %s4693_s16, %s4154_s11  ;;  %p4158_p4 = scmp.lt.u32.totalorder %s4154_s11, %s4693_s16 }
 0x76f   :  { %p4160_p5 = pnand %p4158_p4, %p4155_p3 }
 0x771   :  { %4163 = shalt.err (!%p4160_p5)
}
 0x772   :  { %3139 = dma.vmem_to_hbm [thread:$0]  %s3137_s23, 32, %s4693_s16, [#allocation4]  }
 0x773   :  { %4170 = dma.done.wait [#allocation4], 32  }
 0x774   :  { %4171 = vsyncadd [#allocation4], 4294967264 }
 0x775   :  { %3143 = vsyncpa [#allocation3], 1 }
 0x776   :  { %3144 = vsyncpa [#allocation6], 1 }
 0x777   :  { %3145 = vsyncpa [#allocation9], 1 }
 0x778   :  { %3146 = vsyncpa [#allocation4], 1 }

</bundles_post_ra>
